<compile_context>
chip_gen: v5e
topology: v5e:2x2
jax: 0.10.0
libtpu: 0.0.40
codegen_flags: <defaults>
</compile_context>

<pallas_src>
import functools
import math

import jax
import jax.numpy as jnp
from jax.experimental import pallas as pl
from jax.experimental.pallas import tpu as pltpu

EPS = 1e-6
NEG_INF = -1e9


def _layer_norm(v, gamma, beta, eps=EPS):
    # Matches the Annotated-Transformer LayerNorm: mean over last dim,
    # *unbiased* std (Bessel correction), eps added to the std (not variance).
    d = v.shape[-1]
    mean = jnp.mean(v, axis=-1, keepdims=True)
    var = jnp.sum((v - mean) ** 2, axis=-1, keepdims=True) * (1.0 / (d - 1))
    std = jnp.sqrt(var)
    inv = pl.reciprocal(std + eps)          # exact; EUP slot has slack here
    return gamma * (v - mean) * inv + beta


def encoder_layer_kernel(
    x_ref, mask_ref,
    g1_ref, be1_ref,
    wqkv_ref, bqkv_ref, wo_ref, bo_ref,
    g2_ref, be2_ref,
    w1_ref, b1_ref, w2_ref, b2_ref,
    out_ref,
    *, num_heads,
):
    Bb, S, D = x_ref.shape
    dk = D // num_heads
    rows = Bb * S

    # Flatten (Bb, S) rows into one slab: every projection / FFN matmul feeds
    # the MXU Bb*S rows instead of S.
    x = x_ref[...].reshape(rows, D)                                # (rows, D) f32

    # Additive mask bias computed once for the whole block; (mask == 0) matches
    # the reference semantics even for non-binary masks.
    neg_bias = jnp.where(mask_ref[...] == 0.0, NEG_INF, 0.0)       # (Bb, 1, S)

    # ---------------- sublayer 0: x + self_attn(norm(x)) ----------------
    xn = _layer_norm(x, g1_ref[...], be1_ref[...])
    # Fused QKV projection: ONE (rows,D)x(D,3D) MXU pass, f32 accumulation.
    # 1/sqrt(dk) is pre-folded into wq/bq at pack time.
    qkv = jnp.dot(xn.astype(jnp.bfloat16), wqkv_ref[...],
                  preferred_element_type=jnp.float32) + bqkv_ref[...]
    q = qkv[:, :D]
    k = qkv[:, D:2 * D]
    v = qkv[:, 2 * D:]

    # Head-batched attention: one (S,H,dk)->(H,S,dk) relayout per tensor
    # instead of per-head 32-lane slices + a lane-dim concat.
    ctx_rows = []
    for b in range(Bb):                      # static loop; Bb kept small
        r0 = b * S

        def heads(t):
            return t[r0:r0 + S, :].reshape(S, num_heads, dk).transpose(1, 0, 2)

        qh = heads(q).astype(jnp.bfloat16)                         # (H, S, dk)
        kh = heads(k).astype(jnp.bfloat16)
        vh = heads(v).astype(jnp.bfloat16)

        scores = jnp.einsum('hqd,hkd->hqk', qh, kh,
                            preferred_element_type=jnp.float32)    # (H, S, S)
        scores = scores + neg_bias[b][None]                        # (1,1,S) bcast
        m = jnp.max(scores, axis=-1, keepdims=True)
        e = jnp.exp(scores - m)
        p = e * pl.reciprocal(jnp.sum(e, axis=-1, keepdims=True), approx=True)
        ctx_h = jnp.einsum('hqk,hkd->hqd', p.astype(jnp.bfloat16), vh,
                           preferred_element_type=jnp.float32)     # (H, S, dk)
        ctx_rows.append(ctx_h.transpose(1, 0, 2).reshape(S, D))
    ctx = ctx_rows[0] if Bb == 1 else jnp.concatenate(ctx_rows, axis=0)

    # Single output projection over the whole slab (full K=D matmul).
    attn_out = jnp.dot(ctx.astype(jnp.bfloat16), wo_ref[...],
                       preferred_element_type=jnp.float32) + bo_ref[...]
    x1 = x + attn_out

    # ---------------- sublayer 1: x1 + feed_forward(norm(x1)) ----------------
    x1n = _layer_norm(x1, g2_ref[...], be2_ref[...])
    h1 = jnp.dot(x1n.astype(jnp.bfloat16), w1_ref[...],
                 preferred_element_type=jnp.float32) + b1_ref[...]
    h1 = jnp.maximum(h1, 0.0)
    ff = jnp.dot(h1.astype(jnp.bfloat16), w2_ref[...],
                 preferred_element_type=jnp.float32) + b2_ref[...]

    out_ref[...] = (x1 + ff).reshape(Bb, S, D).astype(out_ref.dtype)


def pack_params(params, num_heads):
    """One-time parameter preprocessing (hoisted out of the per-call path):
    QKV concat, bf16 casts of matmul weights, 1/sqrt(dk) folded into wq/bq."""
    D = params["wq"].shape[0]
    scale = 1.0 / math.sqrt(D // num_heads)
    return dict(
        g1=params["g1"], be1=params["be1"],
        wqkv=jnp.concatenate(
            [params["wq"] * scale, params["wk"], params["wv"]],
            axis=1).astype(jnp.bfloat16),
        bqkv=jnp.concatenate(
            [params["bq"] * scale, params["bk"], params["bv"]], axis=1),
        wo=params["wo"].astype(jnp.bfloat16), bo=params["bo"],
        g2=params["g2"], be2=params["be2"],
        w1=params["w1"].astype(jnp.bfloat16), b1=params["b1"],
        w2=params["w2"].astype(jnp.bfloat16), b2=params["b2"],
    )


def _pick_block_b(B, S, target_rows=256):
    """Largest divisor of B such that block_b*S rows stay MXU-sized and (when
    B >= 2) the grid keeps >= 2 parallel steps so both v7x TCs get work."""
    best = 1
    for cand in range(1, B + 1):
        if B % cand:
            continue
        if cand * S > target_rows:
            continue
        if B >= 2 and B // cand < 2:
            continue
        best = cand
    return best


def encoder_layer(x, mask, packed, num_heads, block_b=None):
    B, S, D = x.shape
    Dff = packed["w1"].shape[1]
    if block_b is None:
        block_b = _pick_block_b(B, S)
    assert B % block_b == 0

    param_list = [
        packed["g1"], packed["be1"],
        packed["wqkv"], packed["bqkv"], packed["wo"], packed["bo"],
        packed["g2"], packed["be2"],
        packed["w1"], packed["b1"], packed["w2"], packed["b2"],
    ]

    in_specs = [
        pl.BlockSpec((block_b, S, D), lambda i: (i, 0, 0)),   # x
        pl.BlockSpec((block_b, 1, S), lambda i: (i, 0, 0)),   # mask
    ]
    for p in param_list:
        # Constant index_map -> parameters fetched once, stay resident.
        in_specs.append(pl.BlockSpec(p.shape, lambda i, nd=p.ndim: (0,) * nd))

    # Advisory cost estimate for XLA's scheduler.
    flops = int(2 * B * S * D * 3 * D        # QKV projection
                + 4 * B * S * S * D          # QK^T + PV
                + 2 * B * S * D * D          # Wo projection
                + 4 * B * S * D * Dff)       # FFN
    transcendentals = int(B * num_heads * S * S + 8 * B * S)
    bytes_accessed = int(
        2 * x.size * x.dtype.itemsize
        + mask.size * mask.dtype.itemsize
        + sum(p.size * p.dtype.itemsize for p in param_list))

    kernel = functools.partial(encoder_layer_kernel, num_heads=num_heads)

    return pl.pallas_call(
        kernel,
        out_shape=jax.ShapeDtypeStruct((B, S, D), x.dtype),
        grid=(B // block_b,),
        in_specs=in_specs,
        out_specs=pl.BlockSpec((block_b, S, D), lambda i: (i, 0, 0)),
        compiler_params=pltpu.CompilerParams(
            dimension_semantics=("parallel",),
            # Safe on every generation at these shapes; raise to 64-100 MiB on
            # 128 MiB parts (v5e/v6e) / cap ~48-56 MiB on v7x for bigger tiles.
            vmem_limit_bytes=32 * 1024 * 1024),
        cost_estimate=pl.CostEstimate(
            flops=flops, transcendentals=transcendentals,
            bytes_accessed=bytes_accessed),
    )(x, mask, *param_list)


# ---------------- pure-JAX reference (for correctness check) ----------------
def reference(x, mask, params, num_heads):
    B, S, D = x.shape
    dk = D // num_heads

    def ln(v, g, b):
        mean = jnp.mean(v, axis=-1, keepdims=True)
        var = jnp.sum((v - mean) ** 2, axis=-1, keepdims=True) / (D - 1)
        return g * (v - mean) / (jnp.sqrt(var) + EPS) + b

    xn = ln(x, params["g1"], params["be1"])
    q = xn @ params["wq"] + params["bq"]
    k = xn @ params["wk"] + params["bk"]
    v = xn @ params["wv"] + params["bv"]

    def split(t):  # (B,S,D) -> (B,H,S,dk)
        return t.reshape(B, S, num_heads, dk).transpose(0, 2, 1, 3)

    qh, kh, vh = split(q), split(k), split(v)
    scores = jnp.einsum("bhqd,bhkd->bhqk", qh, kh) / math.sqrt(dk)
    scores = jnp.where(mask[:, None, :, :] == 0, -1e9, scores)
    p = jax.nn.softmax(scores, axis=-1)
    ctx = jnp.einsum("bhqk,bhkd->bhqd", p, vh)
    ctx = ctx.transpose(0, 2, 1, 3).reshape(B, S, D)
    attn_out = ctx @ params["wo"] + params["bo"]
    x1 = x + attn_out

    x1n = ln(x1, params["g2"], params["be2"])
    ff = jnp.maximum(x1n @ params["w1"] + params["b1"], 0.0) @ params["w2"] + params["b2"]
    return x1 + ff


if __name__ == "__main__":
    # Lane-dense demo shapes: D and Dff are multiples of 128.
    B, S, D, H, Dff = 2, 8, 128, 4, 256

    key = jax.random.PRNGKey(0)
    ks = jax.random.split(key, 12)

    def rnd(k, shape, scale=0.05):
        return (scale * jax.random.normal(k, shape)).astype(jnp.float32)

    params = {
        "g1": jnp.ones((1, D), jnp.float32), "be1": jnp.zeros((1, D), jnp.float32),
        "wq": rnd(ks[0], (D, D)), "bq": rnd(ks[1], (1, D)),
        "wk": rnd(ks[2], (D, D)), "bk": rnd(ks[3], (1, D)),
        "wv": rnd(ks[4], (D, D)), "bv": rnd(ks[5], (1, D)),
        "wo": rnd(ks[6], (D, D)), "bo": rnd(ks[7], (1, D)),
        "g2": jnp.ones((1, D), jnp.float32), "be2": jnp.zeros((1, D), jnp.float32),
        "w1": rnd(ks[8], (D, Dff)), "b1": rnd(ks[9], (1, Dff)),
        "w2": rnd(ks[10], (Dff, D)), "b2": rnd(ks[11], (1, D)),
    }

    x = jax.random.normal(jax.random.PRNGKey(42), (B, S, D), jnp.float32)
    # batch 0: all positions visible; batch 1: last 2 key positions masked.
    mask = jnp.stack([
        jnp.ones((1, S), jnp.float32),
        (jnp.arange(S) < S - 2).astype(jnp.float32)[None, :],
    ], axis=0)  # (B, 1, S)

    # One-time parameter packing (outside the per-call path).
    packed = pack_params(params, num_heads=H)

    out = encoder_layer(x, mask, packed, num_heads=H)
    out = jax.block_until_ready(out)

    ref = reference(x, mask, params, num_heads=H)
    assert out.shape == (B, S, D)
    # Tolerance accounts for bf16 MXU operands + approx (EUP) softmax
    # reciprocal in the kernel vs. the all-f32 exact reference.
    assert jnp.allclose(out, ref, atol=3e-2, rtol=3e-2), "mismatch vs reference"

    print("KERNEL_OK")
</pallas_src>

<mosaic_0001>
module attributes {stable_mosaic.version = 11 : i64} {
  func.func @encoder_layer_kernel(%arg0: i32, %arg1: memref<1x8x128xf32, #tpu.memory_space<vmem>>, %arg2: memref<1x1x8xf32, #tpu.memory_space<vmem>>, %arg3: memref<1x128xf32, #tpu.memory_space<vmem>>, %arg4: memref<1x128xf32, #tpu.memory_space<vmem>>, %arg5: memref<128x384xbf16, #tpu.memory_space<vmem>>, %arg6: memref<1x384xf32, #tpu.memory_space<vmem>>, %arg7: memref<128x128xbf16, #tpu.memory_space<vmem>>, %arg8: memref<1x128xf32, #tpu.memory_space<vmem>>, %arg9: memref<1x128xf32, #tpu.memory_space<vmem>>, %arg10: memref<1x128xf32, #tpu.memory_space<vmem>>, %arg11: memref<128x256xbf16, #tpu.memory_space<vmem>>, %arg12: memref<1x256xf32, #tpu.memory_space<vmem>>, %arg13: memref<256x128xbf16, #tpu.memory_space<vmem>>, %arg14: memref<1x128xf32, #tpu.memory_space<vmem>>, %arg15: memref<1x8x128xf32, #tpu.memory_space<vmem>>) attributes {dimension_semantics = [#tpu.dimension_semantics<parallel>], iteration_bounds = array<i64: 2>, scalar_prefetch = 0 : i64, scratch_operands = 0 : i64, tpu.core_type = #tpu.core_type<tc>, window_params = [{transform_indices = @transform_0, window_bounds = array<i64: 1, 8, 128>}, {transform_indices = @transform_1, window_bounds = array<i64: 1, 1, 8>}, {pipeline_mode = #tpu.pipeline_mode<synchronous>, transform_indices = @transform_2, window_bounds = array<i64: 1, 128>}, {pipeline_mode = #tpu.pipeline_mode<synchronous>, transform_indices = @transform_3, window_bounds = array<i64: 1, 128>}, {pipeline_mode = #tpu.pipeline_mode<synchronous>, transform_indices = @transform_4, window_bounds = array<i64: 128, 384>}, {pipeline_mode = #tpu.pipeline_mode<synchronous>, transform_indices = @transform_5, window_bounds = array<i64: 1, 384>}, {pipeline_mode = #tpu.pipeline_mode<synchronous>, transform_indices = @transform_6, window_bounds = array<i64: 128, 128>}, {pipeline_mode = #tpu.pipeline_mode<synchronous>, transform_indices = @transform_7, window_bounds = array<i64: 1, 128>}, {pipeline_mode = #tpu.pipeline_mode<synchronous>, transform_indices = @transform_8, window_bounds = array<i64: 1, 128>}, {pipeline_mode = #tpu.pipeline_mode<synchronous>, transform_indices = @transform_9, window_bounds = array<i64: 1, 128>}, {pipeline_mode = #tpu.pipeline_mode<synchronous>, transform_indices = @transform_10, window_bounds = array<i64: 128, 256>}, {pipeline_mode = #tpu.pipeline_mode<synchronous>, transform_indices = @transform_11, window_bounds = array<i64: 1, 256>}, {pipeline_mode = #tpu.pipeline_mode<synchronous>, transform_indices = @transform_12, window_bounds = array<i64: 256, 128>}, {pipeline_mode = #tpu.pipeline_mode<synchronous>, transform_indices = @transform_13, window_bounds = array<i64: 1, 128>}, {transform_indices = @transform_14, window_bounds = array<i64: 1, 8, 128>}]} {
    %c0 = arith.constant 0 : index
    %c0_0 = arith.constant 0 : index
    %c0_1 = arith.constant 0 : index
    %0 = vector.load %arg1[%c0, %c0_0, %c0_1] : memref<1x8x128xf32, #tpu.memory_space<vmem>>, vector<1x8x128xf32>
    %1 = vector.shape_cast %0 : vector<1x8x128xf32> to vector<8x128xf32>
    %c0_2 = arith.constant 0 : index
    %c0_3 = arith.constant 0 : index
    %c0_4 = arith.constant 0 : index
    %2 = vector.load %arg2[%c0_2, %c0_3, %c0_4] : memref<1x1x8xf32, #tpu.memory_space<vmem>>, vector<1x1x8xf32>
    %cst = arith.constant 0.000000e+00 : f32
    %3 = vector.broadcast %cst : f32 to vector<1x1x8xf32>
    %4 = arith.cmpf oeq, %2, %3 : vector<1x1x8xf32>
    %cst_5 = arith.constant -1.000000e+09 : f32
    %cst_6 = arith.constant 0.000000e+00 : f32
    %5 = vector.broadcast %cst_5 : f32 to vector<1x1x8xf32>
    %6 = vector.broadcast %cst_6 : f32 to vector<1x1x8xf32>
    %7 = arith.select %4, %5, %6 : vector<1x1x8xi1>, vector<1x1x8xf32>
    %c0_7 = arith.constant 0 : index
    %c0_8 = arith.constant 0 : index
    %8 = vector.load %arg3[%c0_7, %c0_8] : memref<1x128xf32, #tpu.memory_space<vmem>>, vector<1x128xf32>
    %c0_9 = arith.constant 0 : index
    %c0_10 = arith.constant 0 : index
    %9 = vector.load %arg4[%c0_9, %c0_10] : memref<1x128xf32, #tpu.memory_space<vmem>>, vector<1x128xf32>
    %cst_11 = arith.constant dense<0.000000e+00> : vector<8xf32>
    %10 = vector.multi_reduction <add>, %1, %cst_11 [1] : vector<8x128xf32> to vector<8xf32>
    %11 = vector.shape_cast %10 : vector<8xf32> to vector<8x1xf32>
    %cst_12 = arith.constant 1.280000e+02 : f32
    %12 = vector.broadcast %cst_12 : f32 to vector<8x1xf32>
    %13 = arith.divf %11, %12 : vector<8x1xf32>
    %14 = vector.broadcast %13 : vector<8x1xf32> to vector<8x128xf32>
    %15 = arith.subf %1, %14 : vector<8x128xf32>
    %16 = arith.mulf %15, %15 : vector<8x128xf32>
    %cst_13 = arith.constant dense<0.000000e+00> : vector<8xf32>
    %17 = vector.multi_reduction <add>, %16, %cst_13 [1] : vector<8x128xf32> to vector<8xf32>
    %18 = vector.shape_cast %17 : vector<8xf32> to vector<8x1xf32>
    %cst_14 = arith.constant 0.00787401571 : f32
    %19 = vector.broadcast %cst_14 : f32 to vector<8x1xf32>
    %20 = arith.mulf %18, %19 : vector<8x1xf32>
    %21 = math.sqrt %20 : vector<8x1xf32>
    %cst_15 = arith.constant 9.99999997E-7 : f32
    %22 = vector.broadcast %cst_15 : f32 to vector<8x1xf32>
    %23 = arith.addf %21, %22 : vector<8x1xf32>
    %24 = tpu.reciprocal %23 : vector<8x1xf32> -> vector<8x1xf32>
    %25 = vector.broadcast %13 : vector<8x1xf32> to vector<8x128xf32>
    %26 = arith.subf %1, %25 : vector<8x128xf32>
    %27 = vector.broadcast %8 : vector<1x128xf32> to vector<8x128xf32>
    %28 = arith.mulf %27, %26 : vector<8x128xf32>
    %29 = vector.broadcast %24 : vector<8x1xf32> to vector<8x128xf32>
    %30 = arith.mulf %28, %29 : vector<8x128xf32>
    %31 = vector.broadcast %9 : vector<1x128xf32> to vector<8x128xf32>
    %32 = arith.addf %30, %31 : vector<8x128xf32>
    %33 = arith.truncf %32 : vector<8x128xf32> to vector<8x128xbf16>
    %c0_16 = arith.constant 0 : index
    %c0_17 = arith.constant 0 : index
    %34 = vector.load %arg5[%c0_16, %c0_17] : memref<128x384xbf16, #tpu.memory_space<vmem>>, vector<128x384xbf16>
    %cst_18 = arith.constant dense<0.000000e+00> : vector<8x384xf32>
    %35 = tpu.matmul %33, %34, %cst_18 {dimension_numbers = #tpu.dot_dimension_numbers<[1], [0], [0], [1], [0, 0, 1, 1], [], []>} : vector<8x128xbf16>, vector<128x384xbf16>, vector<8x384xf32> -> vector<8x384xf32>
    %c0_19 = arith.constant 0 : index
    %c0_20 = arith.constant 0 : index
    %36 = vector.load %arg6[%c0_19, %c0_20] : memref<1x384xf32, #tpu.memory_space<vmem>>, vector<1x384xf32>
    %37 = vector.broadcast %36 : vector<1x384xf32> to vector<8x384xf32>
    %38 = arith.addf %35, %37 : vector<8x384xf32>
    %39 = vector.extract_strided_slice %38 {offsets = [0, 0], sizes = [8, 128], strides = [1, 1]} : vector<8x384xf32> to vector<8x128xf32>
    %40 = vector.extract_strided_slice %38 {offsets = [0, 128], sizes = [8, 128], strides = [1, 1]} : vector<8x384xf32> to vector<8x128xf32>
    %41 = vector.extract_strided_slice %38 {offsets = [0, 256], sizes = [8, 128], strides = [1, 1]} : vector<8x384xf32> to vector<8x128xf32>
    %42 = vector.shape_cast %39 : vector<8x128xf32> to vector<8x4x32xf32>
    %43 = tpu.transpose %42, [1, 0, 2] : vector<8x4x32xf32> -> vector<4x8x32xf32>
    %44 = arith.truncf %43 : vector<4x8x32xf32> to vector<4x8x32xbf16>
    %45 = vector.shape_cast %40 : vector<8x128xf32> to vector<8x4x32xf32>
    %46 = tpu.transpose %45, [1, 0, 2] : vector<8x4x32xf32> -> vector<4x8x32xf32>
    %47 = arith.truncf %46 : vector<4x8x32xf32> to vector<4x8x32xbf16>
    %48 = vector.shape_cast %41 : vector<8x128xf32> to vector<8x4x32xf32>
    %49 = tpu.transpose %48, [1, 0, 2] : vector<8x4x32xf32> -> vector<4x8x32xf32>
    %50 = arith.truncf %49 : vector<4x8x32xf32> to vector<4x8x32xbf16>
    "tpu.trace_start"() <{level = 10 : i32, message = "hqd,hkd->hqk"}> : () -> ()
    %cst_21 = arith.constant dense<0.000000e+00> : vector<4x8x8xf32>
    %51 = tpu.matmul %44, %47, %cst_21 {dimension_numbers = #tpu.dot_dimension_numbers<[2], [2], [1], [1], [0, 0, 0, 1, 1, 1], [0], [0]>} : vector<4x8x32xbf16>, vector<4x8x32xbf16>, vector<4x8x8xf32> -> vector<4x8x8xf32>
    "tpu.trace_stop"() : () -> ()
    %52 = vector.shape_cast %7 : vector<1x1x8xf32> to vector<1x8xf32>
    %53 = vector.shape_cast %52 : vector<1x8xf32> to vector<1x1x8xf32>
    %54 = vector.broadcast %53 : vector<1x1x8xf32> to vector<4x8x8xf32>
    %55 = arith.addf %51, %54 : vector<4x8x8xf32>
    %cst_22 = arith.constant dense<0xFF800000> : vector<4x8xf32>
    %56 = vector.multi_reduction <maximumf>, %55, %cst_22 [2] : vector<4x8x8xf32> to vector<4x8xf32>
    %57 = vector.shape_cast %56 : vector<4x8xf32> to vector<4x8x1xf32>
    %58 = vector.broadcast %57 : vector<4x8x1xf32> to vector<4x8x8xf32>
    %59 = arith.subf %55, %58 : vector<4x8x8xf32>
    %60 = math.exp %59 : vector<4x8x8xf32>
    %cst_23 = arith.constant dense<0.000000e+00> : vector<4x8xf32>
    %61 = vector.multi_reduction <add>, %60, %cst_23 [2] : vector<4x8x8xf32> to vector<4x8xf32>
    %62 = vector.shape_cast %61 : vector<4x8xf32> to vector<4x8x1xf32>
    %63 = tpu.reciprocal %62 {approx = true} : vector<4x8x1xf32> -> vector<4x8x1xf32>
    %64 = vector.broadcast %63 : vector<4x8x1xf32> to vector<4x8x8xf32>
    %65 = arith.mulf %60, %64 : vector<4x8x8xf32>
    %66 = arith.truncf %65 : vector<4x8x8xf32> to vector<4x8x8xbf16>
    "tpu.trace_start"() <{level = 10 : i32, message = "hqk,hkd->hqd"}> : () -> ()
    %cst_24 = arith.constant dense<0.000000e+00> : vector<4x8x32xf32>
    %67 = tpu.matmul %66, %50, %cst_24 {dimension_numbers = #tpu.dot_dimension_numbers<[2], [1], [1], [2], [0, 0, 0, 1, 1, 2], [0], [0]>} : vector<4x8x8xbf16>, vector<4x8x32xbf16>, vector<4x8x32xf32> -> vector<4x8x32xf32>
    "tpu.trace_stop"() : () -> ()
    %68 = tpu.transpose %67, [1, 0, 2] : vector<4x8x32xf32> -> vector<8x4x32xf32>
    %69 = vector.shape_cast %68 : vector<8x4x32xf32> to vector<8x128xf32>
    %70 = arith.truncf %69 : vector<8x128xf32> to vector<8x128xbf16>
    %c0_25 = arith.constant 0 : index
    %c0_26 = arith.constant 0 : index
    %71 = vector.load %arg7[%c0_25, %c0_26] : memref<128x128xbf16, #tpu.memory_space<vmem>>, vector<128x128xbf16>
    %cst_27 = arith.constant dense<0.000000e+00> : vector<8x128xf32>
    %72 = tpu.matmul %70, %71, %cst_27 {dimension_numbers = #tpu.dot_dimension_numbers<[1], [0], [0], [1], [0, 0, 1, 1], [], []>} : vector<8x128xbf16>, vector<128x128xbf16>, vector<8x128xf32> -> vector<8x128xf32>
    %c0_28 = arith.constant 0 : index
    %c0_29 = arith.constant 0 : index
    %73 = vector.load %arg8[%c0_28, %c0_29] : memref<1x128xf32, #tpu.memory_space<vmem>>, vector<1x128xf32>
    %74 = vector.broadcast %73 : vector<1x128xf32> to vector<8x128xf32>
    %75 = arith.addf %72, %74 : vector<8x128xf32>
    %76 = arith.addf %1, %75 : vector<8x128xf32>
    %c0_30 = arith.constant 0 : index
    %c0_31 = arith.constant 0 : index
    %77 = vector.load %arg9[%c0_30, %c0_31] : memref<1x128xf32, #tpu.memory_space<vmem>>, vector<1x128xf32>
    %c0_32 = arith.constant 0 : index
    %c0_33 = arith.constant 0 : index
    %78 = vector.load %arg10[%c0_32, %c0_33] : memref<1x128xf32, #tpu.memory_space<vmem>>, vector<1x128xf32>
    %cst_34 = arith.constant dense<0.000000e+00> : vector<8xf32>
    %79 = vector.multi_reduction <add>, %76, %cst_34 [1] : vector<8x128xf32> to vector<8xf32>
    %80 = vector.shape_cast %79 : vector<8xf32> to vector<8x1xf32>
    %cst_35 = arith.constant 1.280000e+02 : f32
    %81 = vector.broadcast %cst_35 : f32 to vector<8x1xf32>
    %82 = arith.divf %80, %81 : vector<8x1xf32>
    %83 = vector.broadcast %82 : vector<8x1xf32> to vector<8x128xf32>
    %84 = arith.subf %76, %83 : vector<8x128xf32>
    %85 = arith.mulf %84, %84 : vector<8x128xf32>
    %cst_36 = arith.constant dense<0.000000e+00> : vector<8xf32>
    %86 = vector.multi_reduction <add>, %85, %cst_36 [1] : vector<8x128xf32> to vector<8xf32>
    %87 = vector.shape_cast %86 : vector<8xf32> to vector<8x1xf32>
    %cst_37 = arith.constant 0.00787401571 : f32
    %88 = vector.broadcast %cst_37 : f32 to vector<8x1xf32>
    %89 = arith.mulf %87, %88 : vector<8x1xf32>
    %90 = math.sqrt %89 : vector<8x1xf32>
    %cst_38 = arith.constant 9.99999997E-7 : f32
    %91 = vector.broadcast %cst_38 : f32 to vector<8x1xf32>
    %92 = arith.addf %90, %91 : vector<8x1xf32>
    %93 = tpu.reciprocal %92 : vector<8x1xf32> -> vector<8x1xf32>
    %94 = vector.broadcast %82 : vector<8x1xf32> to vector<8x128xf32>
    %95 = arith.subf %76, %94 : vector<8x128xf32>
    %96 = vector.broadcast %77 : vector<1x128xf32> to vector<8x128xf32>
    %97 = arith.mulf %96, %95 : vector<8x128xf32>
    %98 = vector.broadcast %93 : vector<8x1xf32> to vector<8x128xf32>
    %99 = arith.mulf %97, %98 : vector<8x128xf32>
    %100 = vector.broadcast %78 : vector<1x128xf32> to vector<8x128xf32>
    %101 = arith.addf %99, %100 : vector<8x128xf32>
    %102 = arith.truncf %101 : vector<8x128xf32> to vector<8x128xbf16>
    %c0_39 = arith.constant 0 : index
    %c0_40 = arith.constant 0 : index
    %103 = vector.load %arg11[%c0_39, %c0_40] : memref<128x256xbf16, #tpu.memory_space<vmem>>, vector<128x256xbf16>
    %cst_41 = arith.constant dense<0.000000e+00> : vector<8x256xf32>
    %104 = tpu.matmul %102, %103, %cst_41 {dimension_numbers = #tpu.dot_dimension_numbers<[1], [0], [0], [1], [0, 0, 1, 1], [], []>} : vector<8x128xbf16>, vector<128x256xbf16>, vector<8x256xf32> -> vector<8x256xf32>
    %c0_42 = arith.constant 0 : index
    %c0_43 = arith.constant 0 : index
    %105 = vector.load %arg12[%c0_42, %c0_43] : memref<1x256xf32, #tpu.memory_space<vmem>>, vector<1x256xf32>
    %106 = vector.broadcast %105 : vector<1x256xf32> to vector<8x256xf32>
    %107 = arith.addf %104, %106 : vector<8x256xf32>
    %cst_44 = arith.constant 0.000000e+00 : f32
    %108 = vector.broadcast %cst_44 : f32 to vector<8x256xf32>
    %109 = arith.maximumf %107, %108 : vector<8x256xf32>
    %110 = arith.truncf %109 : vector<8x256xf32> to vector<8x256xbf16>
    %c0_45 = arith.constant 0 : index
    %c0_46 = arith.constant 0 : index
    %111 = vector.load %arg13[%c0_45, %c0_46] : memref<256x128xbf16, #tpu.memory_space<vmem>>, vector<256x128xbf16>
    %cst_47 = arith.constant dense<0.000000e+00> : vector<8x128xf32>
    %112 = tpu.matmul %110, %111, %cst_47 {dimension_numbers = #tpu.dot_dimension_numbers<[1], [0], [0], [1], [0, 0, 1, 1], [], []>} : vector<8x256xbf16>, vector<256x128xbf16>, vector<8x128xf32> -> vector<8x128xf32>
    %c0_48 = arith.constant 0 : index
    %c0_49 = arith.constant 0 : index
    %113 = vector.load %arg14[%c0_48, %c0_49] : memref<1x128xf32, #tpu.memory_space<vmem>>, vector<1x128xf32>
    %114 = vector.broadcast %113 : vector<1x128xf32> to vector<8x128xf32>
    %115 = arith.addf %112, %114 : vector<8x128xf32>
    %116 = arith.addf %76, %115 : vector<8x128xf32>
    %117 = vector.shape_cast %116 : vector<8x128xf32> to vector<1x8x128xf32>
    %c0_50 = arith.constant 0 : index
    %c0_51 = arith.constant 0 : index
    %c0_52 = arith.constant 0 : index
    %118 = vector.load %arg15[%c0_50, %c0_51, %c0_52] : memref<1x8x128xf32, #tpu.memory_space<vmem>>, vector<1x8x128xf32>
    tpu.vector_store %arg15[%c0_50, %c0_51, %c0_52], %117 {strides = array<i32>} : memref<1x8x128xf32, #tpu.memory_space<vmem>>, vector<1x8x128xf32>,
    return
  }
  func.func @transform_0(%arg0: i32) -> (i32, i32, i32) {
    %c0_i32 = arith.constant 0 : i32
    %c0_i32_0 = arith.constant 0 : i32
    %c0_i32_1 = arith.constant 0 : i32
    return %arg0, %c0_i32, %c0_i32_0 : i32, i32, i32
  }
  func.func @transform_1(%arg0: i32) -> (i32, i32, i32) {
    %c0_i32 = arith.constant 0 : i32
    %c0_i32_0 = arith.constant 0 : i32
    %c0_i32_1 = arith.constant 0 : i32
    return %arg0, %c0_i32, %c0_i32_0 : i32, i32, i32
  }
  func.func @transform_2(%arg0: i32) -> (i32, i32) {
    %c0_i32 = arith.constant 0 : i32
    %c0_i32_0 = arith.constant 0 : i32
    %c0_i32_1 = arith.constant 0 : i32
    return %c0_i32, %c0_i32_0 : i32, i32
  }
  func.func @transform_3(%arg0: i32) -> (i32, i32) {
    %c0_i32 = arith.constant 0 : i32
    %c0_i32_0 = arith.constant 0 : i32
    %c0_i32_1 = arith.constant 0 : i32
    return %c0_i32, %c0_i32_0 : i32, i32
  }
  func.func @transform_4(%arg0: i32) -> (i32, i32) {
    %c0_i32 = arith.constant 0 : i32
    %c0_i32_0 = arith.constant 0 : i32
    %c0_i32_1 = arith.constant 0 : i32
    return %c0_i32, %c0_i32_0 : i32, i32
  }
  func.func @transform_5(%arg0: i32) -> (i32, i32) {
    %c0_i32 = arith.constant 0 : i32
    %c0_i32_0 = arith.constant 0 : i32
    %c0_i32_1 = arith.constant 0 : i32
    return %c0_i32, %c0_i32_0 : i32, i32
  }
  func.func @transform_6(%arg0: i32) -> (i32, i32) {
    %c0_i32 = arith.constant 0 : i32
    %c0_i32_0 = arith.constant 0 : i32
    %c0_i32_1 = arith.constant 0 : i32
    return %c0_i32, %c0_i32_0 : i32, i32
  }
  func.func @transform_7(%arg0: i32) -> (i32, i32) {
    %c0_i32 = arith.constant 0 : i32
    %c0_i32_0 = arith.constant 0 : i32
    %c0_i32_1 = arith.constant 0 : i32
    return %c0_i32, %c0_i32_0 : i32, i32
  }
  func.func @transform_8(%arg0: i32) -> (i32, i32) {
    %c0_i32 = arith.constant 0 : i32
    %c0_i32_0 = arith.constant 0 : i32
    %c0_i32_1 = arith.constant 0 : i32
    return %c0_i32, %c0_i32_0 : i32, i32
  }
  func.func @transform_9(%arg0: i32) -> (i32, i32) {
    %c0_i32 = arith.constant 0 : i32
    %c0_i32_0 = arith.constant 0 : i32
    %c0_i32_1 = arith.constant 0 : i32
    return %c0_i32, %c0_i32_0 : i32, i32
  }
  func.func @transform_10(%arg0: i32) -> (i32, i32) {
    %c0_i32 = arith.constant 0 : i32
    %c0_i32_0 = arith.constant 0 : i32
    %c0_i32_1 = arith.constant 0 : i32
    return %c0_i32, %c0_i32_0 : i32, i32
  }
  func.func @transform_11(%arg0: i32) -> (i32, i32) {
    %c0_i32 = arith.constant 0 : i32
    %c0_i32_0 = arith.constant 0 : i32
    %c0_i32_1 = arith.constant 0 : i32
    return %c0_i32, %c0_i32_0 : i32, i32
  }
  func.func @transform_12(%arg0: i32) -> (i32, i32) {
    %c0_i32 = arith.constant 0 : i32
    %c0_i32_0 = arith.constant 0 : i32
    %c0_i32_1 = arith.constant 0 : i32
    return %c0_i32, %c0_i32_0 : i32, i32
  }
  func.func @transform_13(%arg0: i32) -> (i32, i32) {
    %c0_i32 = arith.constant 0 : i32
    %c0_i32_0 = arith.constant 0 : i32
    %c0_i32_1 = arith.constant 0 : i32
    return %c0_i32, %c0_i32_0 : i32, i32
  }
  func.func @transform_14(%arg0: i32) -> (i32, i32, i32) {
    %c0_i32 = arith.constant 0 : i32
    %c0_i32_0 = arith.constant 0 : i32
    %c0_i32_1 = arith.constant 0 : i32
    return %arg0, %c0_i32, %c0_i32_0 : i32, i32, i32
  }
}

</mosaic_0001>

<bundles_post_ra>
// kernel: tpu_custom_call.1
= control target key start
LH: loop header
LB: loop body
LE: loop exit
PB: predicated region body
PF: predicated region fallthrough
CT: control target
= control target key end

     0   :  { %s3590_s0 = inlined_call_operand.hbm [shape: f32[2,8,128], index: 0, kind: input, shape index: {}]   ;;  %s3591_s1 = inlined_call_operand.hbm [shape: f32[2,1,8], index: 1, kind: input, shape index: {}]   ;;  %s3592_s2 = inlined_call_operand.hbm [shape: f32[1,128], index: 2, kind: input, shape index: {}]   ;;  %s3593_s3 = inlined_call_operand.hbm [shape: f32[1,128], index: 3, kind: input, shape index: {}]   ;;  %s3594_s4 = inlined_call_operand.hbm [shape: bf16[128,384], index: 4, kind: input, shape index: {}]   ;;  %s3595_s5 = inlined_call_operand.vmem [shape: f32[1,384], index: 5, kind: input, shape index: {}]   ;;  %s3596_s6 = inlined_call_operand.hbm [shape: bf16[128,128], index: 6, kind: input, shape index: {}]   ;;  %s3597_s7 = inlined_call_operand.vmem [shape: f32[1,128], index: 7, kind: input, shape index: {}]   ;;  %s3598_s8 = inlined_call_operand.vmem [shape: f32[1,128], index: 8, kind: input, shape index: {}]   ;;  %s3599_s9 = inlined_call_operand.vmem [shape: f32[1,128], index: 9, kind: input, shape index: {}]   ;;  %s3600_s10 = inlined_call_operand.hbm [shape: bf16[128,256], index: 10, kind: input, shape index: {}]   ;;  %s3601_s11 = inlined_call_operand.vmem [shape: f32[1,256], index: 11, kind: input, shape index: {}]   ;;  %s3602_s12 = inlined_call_operand.hbm [shape: bf16[256,128], index: 12, kind: input, shape index: {}]   ;;  %s3603_s13 = inlined_call_operand.vmem [shape: f32[1,128], index: 13, kind: input, shape index: {}]   ;;  %s3604_s14 = inlined_call_operand.hbm [shape: f32[2,8,128], index: 14, kind: output, shape index: {}]  }
   0x1   :  { %3609 = sst [smem:[#allocation27_spill]] %s3592_s2 }
   0x2   :  { %3610 = sst [smem:[#allocation28_spill]] %s3593_s3 }
   0x3   :  { %3611 = sst [smem:[#allocation29_spill]] %s3594_s4 }
   0x4   :  { %3612 = sst [smem:[#allocation30_spill]] %s3596_s6 }
   0x5   :  { %3613 = sst [smem:[#allocation31_spill]] %s3600_s10 }
   0x6   :  { %3614 = sst [smem:[#allocation32_spill]] %s3601_s11 }
   0x7   :  { %3615 = sst [smem:[#allocation33_spill]] %s3602_s12 }
   0x8   :  { %3616 = sst [smem:[#allocation34_spill]] %s3603_s13 }
   0x9   :  { %3617 = sst [smem:[#allocation35_spill]] %s3604_s14 }
   0xa   :  { %19 = vsyncpa [#allocation3], 0 }
   0xb   :  { %21 = vsyncpa [#allocation3 + $0x1], 0 }
   0xc   :  { %22 = vsyncpa [#allocation6], 0 }
   0xd   :  { %24 = vsyncpa [#allocation6 + $0x1], 0 }
   0xe   :  { %25 = vsyncpa [#allocation9], 0 }
   0xf   :  { %26 = vsyncpa [#allocation12], 0 }
  0x10   :  { %27 = vsyncpa [#allocation15], 0 }
  0x11   :  { %28 = vsyncpa [#allocation4], 0 }
  0x12   :  { %30 = vsyncpa [#allocation4 + $0x1], 0  ;;  %s3103_s29 = smov 0   ;;  %s3105_s30 = smov 0  }
  0x13   :  { %s3107_s15 = smov 0   ;;  %s3109_s16 = smov 0  }
  0x14 LB: > { %3618 = sst [smem:[#allocation24_spill]] %s3003_s15  ;;  %s3127_s20 = sadd.s32 4294967295, %s3007_s16   ;;  %s3007_s16 = sphi %s3109_s16, %s3638_s16   ;;  %s3003_s15 = sphi %s3107_s15, %s3640_s15   ;;  %s2999_s30 = sphi %s3105_s30, %s3642_s30   ;;  %s2995_s29 = sphi %s3103_s29, %s3641_s29  }
  0x15   : > { %s3619_s2 = sld [smem:[#allocation27_spill]]  ;;  %p2172_p0 = scmp.ge.s32.totalorder %s3007_s16, 1 }
  0x16   : > { %p57_p1 = scmp.eq.s32.totalorder %s3127_s20, 0  ;;  %p371_p2 = scmp.lt.s32.totalorder %s3007_s16, 3 }
  0x17   : > { %s3009_s22 = smov [#allocation7]   ;;  %s3621_s3 = sld [smem:[#allocation28_spill]] }
  0x18   : > { %p3132_p3 = pnand %p2172_p0, %p371_p2  ;;  %s385_s23 = sshll.u32 %s3009_s22, 4  ;;  %s386_s23 = int_to_ptr.vmem [resolvable:$true] %s385_s23 }
  0x19   : > { %s3010_s28 = smov [#allocation8]   ;;  %s3623_s6 = sld [smem:[#allocation30_spill]] }
  0x1a   : > { %p2553_p5 = pneg %p3132_p3  ;;  %s397_s17 = sshll.u32 %s3010_s28, 4  ;;  %s398_s17 = int_to_ptr.vmem [resolvable:$true] %s397_s17 }
  0x1b   : > { %s383_s19 = sshll.u32 %s3619_s2, 4  ;;  %s3011_s24 = smov [#allocation11]   ;;  %s384_s19 = int_to_ptr.hbm [resolvable:$true] %s383_s19 }
  0x1c   : > { %p3144_p6 = pnand %p2553_p5, %p57_p1  ;;  %s425_s25 = sshll.u32 %s3011_s24, 4  ;;  %s426_s25 = int_to_ptr.vmem [resolvable:$true] %s425_s25 }
  0x1d   : > { %s395_s26 = sshll.u32 %s3621_s3, 4  ;;  %s3624_s4 = sld [smem:[#allocation29_spill]]  ;;  %s396_s26 = int_to_ptr.hbm [resolvable:$true] %s395_s26 }
  0x1e   : > { %2556 = dma.hbm_to_vmem [thread:$0]  (!%p3144_p6), %s384_s19, 16, %s386_s23, [#allocation6]  }
  0x1f   : > { %s423_s2 = sshll.u32 %s3623_s6, 4  ;;  %s3012_s11 = smov 64   ;;  %s424_s2 = int_to_ptr.hbm [resolvable:$true] %s423_s2 }
  0x20   : > { %2559 = dma.hbm_to_vmem [thread:$0]  (!%p3144_p6), %s396_s26, 16, %s398_s17, [#allocation9]  }
  0x21   : > { %s3013_s28 = smov 4   ;;  %s3014_s18 = smov [#allocation10]  }
  0x22   : > { %2565 = dma.hbm_to_vmem [thread:$0]  (!%p3144_p6), %s424_s2, 1024, %s426_s25, [#allocation12], %s3012_s11, %s3012_s11, %s3013_s28  }
  0x23   : > { %s406_s13 = sshll.u32 %s3624_s4, 4  ;;  %s408_s22 = sshll.u32 %s3014_s18, 4  ;;  %s407_s13 = int_to_ptr.hbm [resolvable:$true] %s406_s13  ;;  %s409_s22 = int_to_ptr.vmem [resolvable:$true] %s408_s22 }
  0x24   : > { %s3015_s6 = smov 192   ;;  %s3016_s19 = smov 12  }
  0x25   : > { %2562 = dma.hbm_to_vmem [thread:$0]  (!%p3144_p6), %s407_s13, 3072, %s409_s22, [#allocation9], %s3015_s6, %s3015_s6, %s3016_s19  }
  0x26   : > { %s3625_s10 = sld [smem:[#allocation31_spill]]  ;;  %s3017_s2 = smov [#allocation13]  }
  0x27   : > { %s448_s14 = sshll.u32 %s3017_s2, 4  ;;  %s3626_s12 = sld [smem:[#allocation33_spill]]  ;;  %s449_s14 = int_to_ptr.vmem [resolvable:$true] %s448_s14 }
  0x28   : > { %s3018_s6 = smov 128   ;;  %s3019_s13 = smov 8  }
  0x29   : > { %s3020_s18 = smov [#allocation14]   ;;  %s2171_s19 = sadd.s32 4294967294, %s3007_s16  }
  0x2a   : > { %s465_s22 = sshll.u32 %s3020_s18, 4  ;;  %s3174_s23 = sadd.s32 1, %s3007_s16   ;;  %s466_s22 = int_to_ptr.vmem [resolvable:$true] %s465_s22 }
  0x2b   : > { %3627 = sst [smem:[#allocation25_spill]] %s3174_s23  ;;  %s40_s26 = ssub.s32 %s3007_s16, %s3174_s23 }
  0x2c   : > { %s446_s3 = sshll.u32 %s3625_s10, 4  ;;  %s43_s2 = sadd.s32 1, %s3003_s15  ;;  %s447_s3 = int_to_ptr.hbm [resolvable:$true] %s446_s3 }
  0x2d   : > { %s463_s25 = sshll.u32 %s3626_s12, 4  ;;  %p41_p7 = scmp.eq.s32.totalorder %s40_s26, 0  ;;  %s464_s25 = int_to_ptr.hbm [resolvable:$true] %s463_s25 }
  0x2e   : > { %2568 = dma.hbm_to_vmem [thread:$0]  (!%p3144_p6), %s447_s3, 2048, %s449_s14, [#allocation12], %s3018_s6, %s3018_s6, %s3019_s13  }
  0x2f   : > { %2571 = dma.hbm_to_vmem [thread:$0]  (!%p3144_p6), %s464_s25, 2048, %s466_s22, [#allocation15], %s3012_s11, %s3012_s11, %s3013_s28  }
  0x30   : > { %p50_p8 = scmp.ne.s32.totalorder %s3003_s15, %s2999_s30  ;;  %p51_p9 = scmp.eq.s32.totalorder %s3007_s16, 0 }
  0x31   : > { %p56_p10 = scmp.ne.s32.totalorder %s2999_s30, %s2995_s29  ;;  %p358_p13 = scmp.eq.s32.totalorder %s3127_s20, 1 }
  0x32   : > { %s3185_s3 = scalar_select %p41_p7, %s3003_s15, %s43_s2  }
  0x33   : > { %p3187_p11 = por %p51_p9, %p50_p8  ;;  %p3193_p12 = por %p57_p1, %p56_p10 }
  0x34   : > { %3628 = sst [smem:[#allocation26_spill]] %s3185_s3  ;;  %p364_p0 = scmp.eq.s32.totalorder %s2171_s19, 1 }
  0x35   : > { %p2589_p2 = scmp.lt.s32.totalorder %s3007_s16, 2  ;;  %s3200_s27 = sand.u32 1, %s3003_s15  }
  0x36   : > { %p3202_p5 = por %p358_p13, %p50_p8  ;;  %p3206_p6 = por %p364_p0, %p56_p10 }
  0x37   : > { %s2180_s24 = sshll.u32 %s3200_s27, 3  ;;  %s2181_s25 = sshll.u32 %s3007_s16, 3 }
  0x38   : > { %s490_s18 = scalar_lea.hbm %s3590_s0, %s2181_s25  ;;  %s486_s22 = scalar_lea.vmem [#allocation2], %s2180_s24 }
  0x39   : > { %s494_s19 = sshll.u32 %s486_s22, 4  ;;  %s492_s26 = sshll.u32 %s490_s18, 4  ;;  %s495_s19 = int_to_ptr.vmem [resolvable:$true] %s494_s19  ;;  %s493_s26 = int_to_ptr.hbm [resolvable:$true] %s492_s26 }
  0x3a   : > { %p3217_p7 = pnand %p2589_p2, %p3187_p11  ;;  %s501_s4 = sand.u32 1, %s3007_s16  }
  0x3b   : > { %s483_s10 = scalar_lea.sflag [#allocation3], %s3200_s27  ;;  %s2861_s12 = sshra.s32 %s493_s26, 4  ;;  %s2862_s12 = int_to_ptr.hbm [resolvable:$true] %s2861_s12 }
  0x3c   : > { %s2863_s3 = scalar_lea.hbm %s2862_s12, 8  ;;  %p2865_p9 = pneg %p3217_p7 }
  0x3d   : > { %p2864_p8 = scmp.ne.s32.totalorder %s2862_s12, %s2863_s3  ;;  %s2868_s25 = scalar_lea.hbm %s3590_s0, 16 }
  0x3e   : > { %p2869_p11 = scmp.lt.s32.totalorder %s2862_s12, %s3590_s0  ;;  %p2870_p0 = scmp.lt.s32.totalorder %s2868_s25, %s2863_s3 }
  0x3f   : > { %p2866_p10 = pnand %p2865_p9, %p2864_p8 }
  0x40   : > { %p2871_p2 = por %p2870_p0, %p2869_p11 }
  0x41   : > { %p2867_p13 = pneg %p2866_p10 }
  0x43   : > { %p2872_p4 = pnand %p2871_p2, %p2867_p13 }
  0x45   : > { %2875 = shalt.err (!%p2872_p4)
}
  0x46   : > { %2575 = dma.hbm_to_vmem [thread:$0]  (!%p3217_p7), %s493_s26, 128, %s495_s19, %s483_s10  }
  0x47   : > { %s507_s15 = scalar_lea.hbm %s3591_s1, %s3007_s16  ;;  %s504_s24 = scalar_lea.vmem [#allocation5], %s3200_s27 }
  0x48   : > { %s511_s14 = sshll.u32 %s504_s24, 4  ;;  %s509_s23 = sshll.u32 %s507_s15, 4  ;;  %s512_s14 = int_to_ptr.vmem [resolvable:$true] %s511_s14  ;;  %s510_s23 = int_to_ptr.hbm [resolvable:$true] %s509_s23 }
  0x49   : > { %s502_s12 = scalar_lea.sflag [#allocation6], %s501_s4  ;;  %s2891_s3 = sshra.s32 %s510_s23, 4  ;;  %s2892_s3 = int_to_ptr.hbm [resolvable:$true] %s2891_s3 }
  0x4a   : > { %s2893_s25 = scalar_lea.hbm %s2892_s3, 1  ;;  %s2898_s19 = scalar_lea.hbm %s3591_s1, 2 }
  0x4b   : > { %p2894_p4 = scmp.ne.s32.totalorder %s2892_s3, %s2893_s25  ;;  %p2899_p13 = scmp.lt.s32.totalorder %s2892_s3, %s3591_s1 }
  0x4c   : > { %p2900_p11 = scmp.lt.s32.totalorder %s2898_s19, %s2893_s25 }
  0x4d   : > { %p2896_p8 = pnand %p2894_p4, %p2865_p9 }
  0x4e   : > { %p2901_p0 = por %p2900_p11, %p2899_p13 }
  0x4f   : > { %p2897_p10 = pneg %p2896_p8 }
  0x51   : > { %p2902_p2 = pnand %p2901_p0, %p2897_p10 }
  0x53   : > { %2905 = shalt.err (!%p2902_p2)
}
  0x54   : > { %2578 = dma.hbm_to_vmem [thread:$0]  (!%p3217_p7), %s510_s23, 16, %s512_s14, %s502_s12  }
  0x55   : > { %520 = sbr.rel (%p3132_p3) target bundleno = 2067 (0x813), region = 76  ;;  %s3255_s4 = sand.u32 (!%p3132_p3), 1, %s2999_s30  }
  0x56   : > { %s2183_s15 = sshll.u32 (!%p3132_p3), %s3255_s4, 3  ;;  %s523_s27 = scalar_lea.sflag (!%p3132_p3), [#allocation3], %s3255_s4 }
  0x57   : > { %s3261_s18 = scalar_lea.vmem (!%p3132_p3), [#allocation2], %s2183_s15 }
  0x5a   : > { %2966 = dma.done.wait (%p3193_p12), %s523_s27, 128  }
  0x5b   : > { %2968 = vsyncadd (%p3193_p12), %s523_s27, 4294967168  ;;  %s532_s21 = sand.u32 1, %s3127_s20   ;;  %s535_s2 = scalar_lea.vmem [#allocation5], %s3255_s4 }
  0x5c   : > { %s533_s23 = scalar_lea.sflag [#allocation6], %s532_s21 }
  0x5d   : > { %2970 = dma.done.wait (%p3193_p12), %s533_s23, 16  }
  0x5e   : > { %2972 = vsyncadd (%p3193_p12), %s533_s23, 4294967280 }
  0x5f   : > { %2974 = dma.done.wait (%p57_p1), [#allocation6], 16  }
  0x60   : > { %2976 = vsyncadd (%p57_p1), [#allocation6], 4294967280 }
  0x61   : > { %2978 = dma.done.wait (%p57_p1), [#allocation9], 3088  }
  0x62   : > { %2980 = vsyncadd (%p57_p1), [#allocation9], 4294964208 }
  0x63   : > { %2982 = dma.done.wait (%p57_p1), [#allocation12], 3072  }
  0x64   : > { %2984 = vsyncadd (%p57_p1), [#allocation12], 4294964224 }
  0x65   : > { %2986 = dma.done.wait (%p57_p1), [#allocation15], 2048  }
  0x66   : > { %2988 = vsyncadd (%p57_p1), [#allocation15], 4294965248  ;;  %v616_v0 = vld [vmem:[%s3261_s18] sm:$0xff]  ;;  %v3021_v1 = vmov 128.0   ;;  %v2482_v18 = vld [vmem:[#allocation10 + $0xb8] sm:$0xf0] }
  0x67   : > { %622 = vadd.xlane.f32.xlu0 %v616_v0  ;;  %2654 = vrcp.f32 %v3021_v1  ;;  %v2277_v12 = vld [vmem:[#allocation10 + $0xa8] sm:$0xf]  ;;  %v2481_v13 = vld [vmem:[#allocation10 + $0xb0] sm:$0xf0]  ;;  %v2480_v14 = vld [vmem:[#allocation10 + $0xac] sm:$0xf] }
  0x68   : > { %v2278_v15 = vor.u32 %v2481_v13, %v2277_v12  ;;  %v2279_v16 = vld [vmem:[#allocation10 + $0xb4] sm:$0xf0]  ;;  %v2285_v17 = vld [vmem:[#allocation10 + $0xb0] sm:$0xf]  ;;  %v2478_v22 = vld [vmem:[#allocation10 + $0x98] sm:$0xf0] }
  0x69   : > { %v2282_v19 = vor.u32 %v2480_v14, %v2279_v16  ;;  %v2286_v20 = vor.u32 %v2482_v18, %v2285_v17  ;;  %v2265_v21 = vld [vmem:[#allocation10 + $0x90] sm:$0xf]  ;;  %v2477_v23 = vld [vmem:[#allocation10 + $0x94] sm:$0xf]  ;;  %v2267_v25 = vld [vmem:[#allocation10 + $0x9c] sm:$0xf0] }
  0x6a   : > { %842 = vmatpush.bf16.msra.mxu0 %v2278_v15  ;;  %v2266_v24 = vor.u32 %v2478_v22, %v2265_v21  ;;  %v2273_v26 = vld [vmem:[#allocation10 + $0x98] sm:$0xf]  ;;  %v2479_v27 = vld [vmem:[#allocation10 + $0xa0] sm:$0xf0]  ;;  %v2270_v28 = vor.u32 %v2477_v23, %v2267_v25  ;;  %v2474_v32 = vld [vmem:[#allocation10 + $0x7c] sm:$0xf] }
  0x6b   : > { %855 = vmatpush.bf16.msra.mxu1 %v2282_v19  ;;  %868 = vmatpush.bf16.msra.mxu2 %v2286_v20  ;;  %v2274_v29 = vor.u32 %v2479_v27, %v2273_v26  ;;  %v2253_v30 = vld [vmem:[#allocation10 + $0x78] sm:$0xf]  ;;  %v2475_v31 = vld [vmem:[#allocation10 + $0x80] sm:$0xf0]  ;;  %v2255_v34 = vld [vmem:[#allocation10 + $0x84] sm:$0xf0] }
  0x6c   : > { %v2254_v33 = vor.u32 %v2475_v31, %v2253_v30  ;;  %v2261_v35 = vld [vmem:[#allocation10 + $0x80] sm:$0xf]  ;;  %v2476_v36 = vld [vmem:[#allocation10 + $0x88] sm:$0xf0]  ;;  %v2258_v37 = vor.u32 %v2474_v32, %v2255_v34  ;;  %v2471_v41 = vld [vmem:[#allocation10 + $0x64] sm:$0xf] }
  0x6d   : > { %v2655_v2 = vpop.eup %2654  ;;  %v2262_v38 = vor.u32 %v2476_v36, %v2261_v35  ;;  %v2241_v39 = vld [vmem:[#allocation10 + $0x60] sm:$0xf]  ;;  %v2472_v40 = vld [vmem:[#allocation10 + $0x68] sm:$0xf0]  ;;  %v2243_v42 = vld [vmem:[#allocation10 + $0x6c] sm:$0xf0] }
  0x6e   : > { %v625_v3 = vmul.f32 128.0, %v2655_v2  ;;  %vm629_vm0 = vweird.f32 %v2655_v2  ;;  %843 = vmatpush.bf16.msra.mxu0 %v2266_v24  ;;  %v2249_v43 = vld [vmem:[#allocation10 + $0x68] sm:$0xf]  ;;  %v2473_v44 = vld [vmem:[#allocation10 + $0x70] sm:$0xf0]  ;;  %v2242_v45 = vor.u32 %v2472_v40, %v2241_v39  ;;  %v2246_v46 = vor.u32 %v2471_v41, %v2243_v42  ;;  %s3022_s24 = smov 32  }
  0x6f   : > { %856 = vmatpush.bf16.msra.mxu1 %v2270_v28  ;;  %869 = vmatpush.bf16.msra.mxu2 %v2274_v29  ;;  %v2250_v47 = vor.u32 %v2473_v44, %v2249_v43  ;;  %v2229_v48 = vld [vmem:[#allocation10 + $0x48] sm:$0xf]  ;;  %v2469_v49 = vld [vmem:[#allocation10 + $0x50] sm:$0xf0]  ;;  %v2468_v50 = vld [vmem:[#allocation10 + $0x4c] sm:$0xf] }
  0x70   : > { %v626_v4 = vsub.f32 1.0, %v625_v3  ;;  %v2231_v51 = vld [vmem:[#allocation10 + $0x54] sm:$0xf0]  ;;  %v2237_v52 = vld [vmem:[#allocation10 + $0x50] sm:$0xf]  ;;  %v2230_v54 = vor.u32 %v2469_v49, %v2229_v48  ;;  %s3023_s14 = smov 96  }
  0x71   : > { %v2470_v53 = vld [vmem:[#allocation10 + $0x58] sm:$0xf0]  ;;  %v2234_v55 = vor.u32 %v2468_v50, %v2231_v51  ;;  %v2217_v57 = vld [vmem:[#allocation10 + $0x30] sm:$0xf]  ;;  %v2465_v59 = vld [vmem:[#allocation10 + $0x34] sm:$0xf] }
  0x72   : > { %v627_v5 = vmul.f32 %v2655_v2, %v626_v4  ;;  %844 = vmatpush.bf16.msra.mxu0 %v2254_v33  ;;  %v2238_v56 = vor.u32 %v2470_v53, %v2237_v52  ;;  %v2466_v58 = vld [vmem:[#allocation10 + $0x38] sm:$0xf0]  ;;  %v2219_v61 = vld [vmem:[#allocation10 + $0x3c] sm:$0xf0]  ;;  %v2225_v62 = vld [vmem:[#allocation10 + $0x38] sm:$0xf] }
  0x73   : > { %857 = vmatpush.bf16.msra.mxu1 %v2258_v37  ;;  %870 = vmatpush.bf16.msra.mxu2 %v2262_v38  ;;  %v2467_v63 = vld [vmem:[#allocation10 + $0x40] sm:$0xf0]  ;;  %v2218_v1 = vor.u32 %v2466_v58, %v2217_v57  ;;  %v2205_v4 = vld [vmem:[#allocation10 + $0x18] sm:$0xf]  ;;  %v2193_v15 = vld [vmem:[#allocation10] sm:$0xf] }
  0x74   : > { %v628_v6 = vadd.f32 %v2655_v2, %v627_v5  ;;  %v2226_v3 = vor.u32 %v2467_v63, %v2225_v62  ;;  %v2463_v5 = vld [vmem:[#allocation10 + $0x20] sm:$0xf0]  ;;  %v2460_v16 = vld [vmem:[#allocation10 + $0x8] sm:$0xf0]  ;;  %v2195_v18 = vld [vmem:[#allocation10 + $0xc] sm:$0xf0] }
  0x75   : > { %v2206_v12 = vor.u32 %v2463_v5, %v2205_v4  ;;  %v2459_v17 = vld [vmem:[#allocation10 + $0x4] sm:$0xf]  ;;  %v2201_v19 = vld [vmem:[#allocation10 + $0x8] sm:$0xf]  ;;  %v2461_v20 = vld [vmem:[#allocation10 + $0x10] sm:$0xf0]  ;;  %v2194_v23 = vor.u32 %v2460_v16, %v2193_v15 }
  0x76   : > { %v3290_v7 = vsel %vm629_vm0, %v2655_v2, %v628_v6  ;;  %845 = vmatpush.bf16.msra.mxu0 %v2242_v45  ;;  %v2222_v2 = vor.u32 %v2465_v59, %v2219_v61  ;;  %v2462_v6 = vld [vmem:[#allocation10 + $0x1c] sm:$0xf]  ;;  %v2198_v24 = vor.u32 %v2459_v17, %v2195_v18  ;;  %v2202_v25 = vor.u32 %v2461_v20, %v2201_v19  ;;  %v3301_v51 = vld [vmem:[%s3595_s5] sm:$0x7]  ;;  %s3024_s12 = smov 64   ;;  %s2456_s21 = sshll.u32 %s3127_s20, 3 }
  0x77   : > { %858 = vmatpush.bf16.msra.mxu1 %v2246_v46  ;;  %871 = vmatpush.bf16.msra.mxu2 %v2250_v47  ;;  %v2648_v39 = vld [vmem:[#allocation7] ss:$0 sm:$0xff]  ;;  %v2649_v46 = vld [vmem:[#allocation8] ss:$0 sm:$0xff]  ;;  %v708_v52 = vperm.slane %v3301_v51, 0  ;;  %v709_v53 = vperm.slane %v3301_v51, 1 }
  0x78   : > { %v3025_v62 = vmov 1983009808   ;;  %vm892_vm7 = vcmask 1047556   ;;  %vm1257_vm8 = vcmask 261120   ;;  %vm1334_vm10 = vcmask 64512   ;;  %s3635_s11 = sld [smem:[#allocation34_spill]] }
  0x79   : > { %v897_v63 = vunpack.c.l.s4 %v3025_v62  ;;  %vm1386_vm11 = vcmask 1043456   ;;  %vm1583_vm12 = vcmask 523264   ;;  %vm1585_vm13 = vcmask 785408   ;;  %s614_s3 = scalar_lea.vmem [#allocation16], %s2183_s15  ;;  %s2010_s20 = scalar_lea.sflag [#allocation4], %s3255_s4 }
  0x7a   : > { %846 = vmatpush.bf16.msra.mxu0 %v2230_v54  ;;  %s2022_s25 = sshll.u32 %s614_s3, 4  ;;  %s2023_s25 = int_to_ptr.vmem [resolvable:$true] %s2022_s25 }
  0x7b   : > { %859 = vmatpush.bf16.msra.mxu1 %v2234_v55  ;;  %872 = vmatpush.bf16.msra.mxu2 %v2238_v56  ;;  %v3314_v4 = vunpack.c.0.s8 %v897_v63 }
  0x7e   : > { %847 = vmatpush.bf16.msra.mxu0 %v2218_v1 }
  0x7f   : > { %860 = vmatpush.bf16.msra.mxu1 %v2222_v2  ;;  %873 = vmatpush.bf16.msra.mxu2 %v2226_v3 }
  0x82   : > { %848 = vmatpush.bf16.msra.mxu0 %v2206_v12 }
  0x86   : > { %849 = vmatpush.bf16.msra.mxu0 %v2194_v23 }
  0xda   : > { %v623_v8 = vpop.xlane.xlu0 %622 }
  0xdb   : > { %v631_v9 = vmul.f32 %v3290_v7, %v623_v8  ;;  %v2207_v8 = vld [vmem:[#allocation10 + $0x24] sm:$0xf0] }
  0xdc   : > { %v2210_v13 = vor.u32 %v2462_v6, %v2207_v8  ;;  %v3026_v8 = vmov 1934713408  }
  0xdd   : > { %v3293_v10 = vsub.f32 %v616_v0, %v631_v9  ;;  %v2213_v9 = vld [vmem:[#allocation10 + $0x20] sm:$0xf] }
  0xde   : > { %861 = vmatpush.bf16.msra.mxu1 %v2210_v13 }
  0xdf   : > { %v633_v11 = vmul.f32 %v3293_v10, %v3293_v10  ;;  %v667_v44 = vmul.f32 %v2648_v39, %v3293_v10 }
  0xe1   : > { %634 = vadd.xlane.f32.xlu0 %v633_v11  ;;  %v2464_v11 = vld [vmem:[#allocation10 + $0x28] sm:$0xf0] }
  0xe2   : > { %v2214_v14 = vor.u32 %v2464_v11, %v2213_v9  ;;  %862 = vmatpush.bf16.msra.mxu1 %v2198_v24  ;;  %v921_v9 = vunpack.c.l.s4 %v3026_v8 }
  0xe4   : > { %874 = vmatpush.bf16.msra.mxu2 %v2214_v14  ;;  %v3319_v17 = vunpack.c.0.s8 %v921_v9 }
  0xe8   : > { %875 = vmatpush.bf16.msra.mxu2 %v2202_v25 }
 0x154   : > { %v635_v60 = vpop.xlane.xlu0 %634 }
 0x155   : > { %v636_v0 = vmul.f32 0.007874016, %v635_v60 }
 0x157   : > { %2656 = vrsqrt.f32 %v636_v0  ;;  %vm644_vm1 = vcmp.eq.f32.partialorder %v636_v0, inf  ;;  %v647_v31 = vand.u32 2147483648, %v636_v0  ;;  %vm646_vm2 = vcmp.eq.f32.partialorder %v636_v0, 0.0 }
 0x15d   : > { %v2657_v21 = vpop.eup %2656 }
 0x15e   : > { %v638_v22 = vmul.f32 %v2657_v21, %v636_v0 }
 0x160   : > { %v639_v26 = vmul.f32 %v2657_v21, %v638_v22 }
 0x162   : > { %v640_v27 = vmul.f32 0.5, %v639_v26 }
 0x164   : > { %v641_v28 = vsub.f32 1.5, %v640_v27 }
 0x166   : > { %v642_v29 = vmul.f32 %v2657_v21, %v641_v28 }
 0x168   : > { %v643_v30 = vmul.f32 %v642_v29, %v636_v0 }
 0x16a   : > { %v645_v32 = vsel %vm644_vm1, %v636_v0, %v643_v30 }
 0x16b   : > { %v648_v33 = vsel %vm646_vm2, %v647_v31, %v645_v32 }
 0x16c   : > { %v649_v34 = vadd.f32 1e-06, %v648_v33 }
 0x16e   : > { %2658 = vrcp.f32 %v649_v34  ;;  %v661_v38 = vand.u32 2147483648, %v649_v34  ;;  %v659_v41 = vand.u32 2147483647, %v649_v34  ;;  %vm655_vm4 = vweird.f32 %v649_v34 }
 0x170   : > { %v662_v43 = vor.u32 1.1754944e-38, %v661_v38  ;;  %vm660_vm6 = vcmp.eq.f32.partialorder %v659_v41, 8.507059e+37 }
 0x174   : > { %v2659_v35 = vpop.eup %2658 }
 0x175   : > { %v651_v36 = vmul.f32 %v2659_v35, %v649_v34  ;;  %vm656_vm3 = vweird.f32 %v2659_v35 }
 0x176   : > { %vm657_vm5 = vmor %vm655_vm4, %vm656_vm3 }
 0x177   : > { %v652_v37 = vsub.f32 1.0, %v651_v36 }
 0x179   : > { %v653_v40 = vmul.f32 %v2659_v35, %v652_v37 }
 0x17b   : > { %v654_v42 = vadd.f32 %v2659_v35, %v653_v40 }
 0x17d   : > { %v658_v45 = vsel %vm657_vm5, %v2659_v35, %v654_v42 }
 0x17e   : > { %v663_v47 = vsel %vm660_vm6, %v662_v43, %v658_v45 }
 0x17f   : > { %v668_v48 = vmul.f32 %v667_v44, %v663_v47 }
 0x181   : > { %v672_v49 = vadd.f32 %v2649_v46, %v668_v48 }
 0x183   : > { %v673_v50 = vpack.c.bf16 %v672_v49, %v672_v49 }
 0x185   : > { %850 = vmatmul.bf16.vlgmr.msra.gmra.mxu0 %v673_v50  ;;  %863 = vmatmul.bf16.vlgmr.msra.gmra.mxu1 %v673_v50 }
 0x186   : > { %876 = vmatmul.bf16.vlgmr.msra.gmra.mxu2 %v673_v50 }
 0x202   : > { %v851_v10 = vpop.f32.mrf.mxu0  ;;  %v864_v54 = vpop.f32.mrf.mxu1 }
 0x203   : > { %v852_v55 = vadd.f32 %v851_v10, %v708_v52  ;;  %v865_v56 = vadd.f32 %v864_v54, %v709_v53 }
 0x205   : > { %1013 = vrot.lane.b32.xlu2 %v865_v56, %s3022_s24  ;;  %1007 = vrot.lane.b32.xlu1 %v865_v56, %s3023_s14  ;;  %v1018_v13 = vrot.slane %v865_v56, 4  ;;  %v894_v15 = vrot.slane %v852_v55, 4 }
 0x206   : > { %885 = vrot.lane.b32.xlu0 %v852_v55, %s3024_s12 }
 0x209   : > { %v3308_v57 = vpop.f32.mrf.mxu2 }
 0x20a   : > { %v853_v58 = vpop.f32.mrf.mxu0  ;;  %v866_v59 = vpop.f32.mrf.mxu1 }
 0x20d   : > { %1010 = vrot.lane.b32.xlu1 %v865_v56, %s3024_s12  ;;  %882 = vrot.lane.b32.xlu2 %v852_v55, %s3023_s14 }
 0x211   : > { %v879_v60 = vpop.f32.mrf.mxu2 }
 0x215   : > { %888 = vrot.lane.b32.xlu1 %v852_v55, %s3022_s24 }
 0x25f   : > { %v1014_v61 = vpop.permute.xlu2 %1013 }
 0x260   : > { %v1028_v2 = vrot.slane %v1014_v61, 4 }
 0x267   : > { %v883_v29 = vpop.permute.xlu2 %882 }
 0x268   : > { %v906_v39 = vrot.slane %v883_v29, 4 }
 0x277   : > { %v1008_v0 = vpop.permute.xlu1 %1007 }
 0x278   : > { %v1030_v1 = vrot.slane %v1008_v0, 4  ;;  %v886_v5 = vpop.permute.xlu0 %885  ;;  %v1029_v6 = vsel %vm892_vm7, %v1028_v2, %v1008_v0 }
 0x279   : > { %v891_v12 = vrot.slane %v886_v5, 4  ;;  %v1035_v14 = vperm.slane %v1029_v6, %v3314_v4  ;;  %v895_v21 = vsel %vm892_vm7, %v886_v5, %v894_v15 }
 0x27a   : > { %v1031_v3 = vsel %vm892_vm7, %v1014_v61, %v1030_v1  ;;  %v903_v30 = vperm.slane %v895_v21, %v3314_v4 }
 0x27b   : > { %v1039_v11 = vperm.slane %v1031_v3, %v3314_v4  ;;  %v893_v23 = vsel %vm892_vm7, %v891_v12, %v852_v55  ;;  %v1040_v25 = vrot.slane %v1035_v14, 4 }
 0x27c   : > { %v899_v32 = vperm.slane %v893_v23, %v3314_v4  ;;  %v930_v46 = vrot.slane %v903_v30, 4 }
 0x27d   : > { %v1052_v20 = vrot.slane %v1039_v11, 4 }
 0x27e   : > { %v918_v45 = vrot.slane %v899_v32, 4 }
 0x27f   : > { %v1011_v16 = vpop.permute.xlu1 %1010 }
 0x280   : > { %v1016_v18 = vrot.slane %v1011_v16, 4  ;;  %v1019_v19 = vsel %vm892_vm7, %v1011_v16, %v1018_v13 }
 0x281   : > { %v1027_v22 = vperm.slane %v1019_v19, %v3314_v4 }
 0x282   : > { %v1017_v24 = vsel %vm892_vm7, %v1016_v18, %v865_v56 }
 0x283   : > { %v1023_v26 = vperm.slane %v1017_v24, %v3314_v4  ;;  %v1053_v27 = vsel %vm892_vm7, %v1052_v20, %v1027_v22  ;;  %v1054_v28 = vrot.slane %v1027_v22, 4 }
 0x284   : > { %v1059_v31 = vperm.slane %v1053_v27, %v3319_v17 }
 0x285   : > { %v1041_v33 = vsel %vm892_vm7, %v1040_v25, %v1023_v26  ;;  %v1042_v34 = vrot.slane %v1023_v26, 4  ;;  %v1055_v35 = vsel %vm892_vm7, %v1039_v11, %v1054_v28 }
 0x286   : > { %v1047_v36 = vperm.slane %v1041_v33, %v3319_v17  ;;  %v1063_v37 = vperm.slane %v1055_v35, %v3319_v17  ;;  %v1068_v38 = vrot.slane %v1059_v31, 4 }
 0x287   : > { %v1043_v40 = vsel %vm892_vm7, %v1035_v14, %v1042_v34  ;;  %v889_v41 = vpop.permute.xlu1 %888 }
 0x288   : > { %v1051_v42 = vperm.slane %v1043_v40, %v3319_v17  ;;  %v1064_v43 = vrot.slane %v1047_v36, 4  ;;  %v1070_v44 = vrot.slane %v1063_v37, 4  ;;  %v904_v47 = vrot.slane %v889_v41, 4 }
 0x289   : > { %v907_v48 = vsel %vm892_vm7, %v889_v41, %v906_v39  ;;  %v1069_v50 = vsel %vm892_vm7, 0.0, %v1068_v38 }
 0x28a   : > { %v1066_v49 = vrot.slane %v1051_v42, 4  ;;  %v1071_v52 = vsel %vm892_vm7, 0.0, %v1070_v44  ;;  %v1083_v53 = vsel %vm892_vm7, %v1070_v44, %v1059_v31  ;;  %v1065_v10 = vsel %vm892_vm7, 0.0, %v1064_v43 }
 0x28b   : > { %v1088_v54 = vrot.slane %v1071_v52, 4  ;;  %v905_v55 = vsel %vm892_vm7, %v904_v47, %v883_v29  ;;  %v915_v56 = vperm.slane %v907_v48, %v3314_v4  ;;  %v1087_v59 = vperm.slane %v1083_v53, %v3314_v4 }
 0x28c   : > { %v1067_v58 = vsel %vm892_vm7, 0.0, %v1066_v49  ;;  %v911_v60 = vperm.slane %v905_v55, %v3314_v4  ;;  %v1072_v61 = vsel %vm892_vm7, %v1066_v49, %v1047_v36 }
 0x28d   : > { %v1077_v62 = vrot.slane %v1067_v58, 4  ;;  %v1089_v63 = vsel %vm892_vm7, %v1088_v54, %v1069_v50  ;;  %v928_v0 = vrot.slane %v915_v56, 4  ;;  %v931_v1 = vsel %vm892_vm7, %v915_v56, %v930_v46 }
 0x28e   : > { %v1093_v2 = vperm.slane %v1089_v63, %v3314_v4  ;;  %v916_v3 = vrot.slane %v911_v60, 4  ;;  %v919_v5 = vsel %vm892_vm7, %v911_v60, %v918_v45  ;;  %v939_v6 = vperm.slane %v931_v1, %v3319_v17 }
 0x28f   : > { %v927_v8 = vperm.slane %v919_v5, %v3319_v17  ;;  %v929_v9 = vsel %vm892_vm7, %v928_v0, %v903_v30  ;;  %v1076_v11 = vperm.slane %v1072_v61, %v3314_v4  ;;  %v1078_v12 = vsel %vm892_vm7, %v1077_v62, %v1065_v10 }
 0x290   : > { %v917_v13 = vsel %vm892_vm7, %v916_v3, %v899_v32  ;;  %v935_v14 = vperm.slane %v929_v9, %v3319_v17  ;;  %v946_v15 = vrot.slane %v939_v6, 4  ;;  %v1082_v16 = vperm.slane %v1078_v12, %v3314_v4 }
 0x291   : > { %v923_v18 = vperm.slane %v917_v13, %v3319_v17  ;;  %v942_v19 = vrot.slane %v927_v8, 4  ;;  %v1096_v20 = vrot.slane %v1076_v11, 4  ;;  %v1106_v21 = vrot.slane %v1093_v2, 4 }
 0x292   : > { %v944_v22 = vrot.slane %v935_v14, 4  ;;  %v947_v23 = vsel %vm892_vm7, 0.0, %v946_v15  ;;  %v959_v24 = vsel %vm892_vm7, %v946_v15, %v935_v14  ;;  %v1094_v25 = vrot.slane %v1082_v16, 4 }
 0x293   : > { %v940_v26 = vrot.slane %v923_v18, 4  ;;  %v943_v27 = vsel %vm892_vm7, 0.0, %v942_v19  ;;  %v963_v28 = vperm.slane %v959_v24, %v3314_v4  ;;  %v964_v29 = vrot.slane %v947_v23, 4 }
 0x294   : > { %v945_v30 = vsel %vm892_vm7, 0.0, %v944_v22  ;;  %v953_v31 = vrot.slane %v943_v27, 4  ;;  %v1095_v32 = vsel %vm892_vm7, %v1094_v25, %v1076_v11  ;;  %v1107_v33 = vsel %vm892_vm7, %v1106_v21, %v1087_v59 }
 0x295   : > { %v941_v34 = vsel %vm892_vm7, 0.0, %v940_v26  ;;  %v965_v35 = vsel %vm892_vm7, %v964_v29, %v945_v30  ;;  %v984_v36 = vrot.slane %v963_v28, 4  ;;  %v1101_v37 = vperm.slane %v1095_v32, %v3319_v17  ;;  %v617_v29 = vld [vmem:[%s535_s2] sm:$0x1] }
 0x296   : > { %v969_v38 = vperm.slane %v965_v35, %v3314_v4  ;;  %v1113_v39 = vperm.slane %v1107_v33, %v3319_v17  ;;  %v1097_v40 = vsel %vm892_vm7, %v1082_v16, %v1096_v20  ;;  %v1108_v41 = vrot.slane %v1087_v59, 4 }
 0x297   : > { %v1105_v42 = vperm.slane %v1097_v40, %v3319_v17  ;;  %v1120_v43 = vrot.slane %v1101_v37, 4  ;;  %v948_v44 = vsel %vm892_vm7, %v942_v19, %v923_v18  ;;  %v954_v45 = vsel %vm892_vm7, %v953_v31, %v941_v34 }
 0x298   : > { %v1118_v46 = vrot.slane %v1113_v39, 4  ;;  %v1109_v47 = vsel %vm892_vm7, %v1093_v2, %v1108_v41  ;;  %v952_v48 = vperm.slane %v948_v44, %v3314_v4  ;;  %v958_v49 = vperm.slane %v954_v45, %v3314_v4 }
 0x299   : > { %v1117_v50 = vperm.slane %v1109_v47, %v3319_v17  ;;  %v1124_v52 = vrot.slane %v1105_v42, 4  ;;  %v1121_v53 = vsel %vm892_vm7, %v1113_v39, %v1120_v43  ;;  %v982_v10 = vrot.slane %v969_v38, 4 }
 0x29a   : > { %v1119_v54 = vsel %vm892_vm7, %v1118_v46, %v1101_v37  ;;  %v1127_v55 = vpack.c.bf16 %v1121_v53, %v1121_v53  ;;  %v970_v56 = vrot.slane %v958_v49, 4  ;;  %v972_v58 = vrot.slane %v952_v48, 4 }
 0x29b   : > { %v1126_v59 = vpack.c.bf16 %v1119_v54, %v1119_v54  ;;  %v1122_v60 = vrot.slane %v1117_v50, 4  ;;  %v1125_v61 = vsel %vm892_vm7, %v1117_v50, %v1124_v52  ;;  %v983_v62 = vsel %vm892_vm7, %v982_v10, %v963_v28 }
 0x29c   : > { %v1129_v63 = vpack.c.bf16 %v1125_v61, %v1125_v61  ;;  %v1281_v0 = vsel %vm1257_vm8, %v1127_v55, 0  ;;  %v971_v1 = vsel %vm892_vm7, %v970_v56, %v952_v48  ;;  %v989_v2 = vperm.slane %v983_v62, %v3319_v17 }
 0x29d   : > { %v1262_v3 = vsel %vm1257_vm8, %v1126_v59, 0  ;;  %v977_v5 = vperm.slane %v971_v1, %v3319_v17  ;;  %v973_v6 = vsel %vm892_vm7, %v958_v49, %v972_v58  ;;  %v985_v8 = vsel %vm892_vm7, %v969_v38, %v984_v36 }
 0x29e   : > { %1271 = vmatpush.bf16.xpose.msra.mxu3 %v1262_v3  ;;  %v1319_v9 = vsel %vm1257_vm8, %v1129_v63, 0  ;;  %v994_v11 = vrot.slane %v989_v2, 4  ;;  %v981_v12 = vperm.slane %v973_v6, %v3319_v17  ;;  %v1123_v13 = vsel %vm892_vm7, %v1122_v60, %v1105_v42 }
 0x29f   : > { %1328 = vmatpush.bf16.xpose.msrb.mxu0 %v1319_v9  ;;  %v993_v15 = vperm.slane %v985_v8, %v3319_v17  ;;  %v1128_v18 = vpack.c.bf16 %v1123_v13, %v1123_v13  ;;  %v996_v23 = vrot.slane %v977_v5, 4  ;;  %vm618_vm9 = vcmp.eq.f32.partialorder %v617_v29, 0.0 }
 0x2a0   : > { %v995_v14 = vsel %vm892_vm7, %v994_v11, %v977_v5  ;;  %v1000_v16 = vrot.slane %v981_v12, 4  ;;  %v3027_v30 = vmov 0.0   ;;  %v710_v45 = vperm.slane %v3301_v51, 2 }
 0x2a1   : > { %v1002_v20 = vpack.c.bf16 %v995_v14, %v995_v14  ;;  %v1300_v22 = vsel %vm1257_vm8, %v1128_v18, 0  ;;  %v997_v24 = vsel %vm892_vm7, %v989_v2, %v996_v23  ;;  %v998_v26 = vrot.slane %v993_v15, 4 }
 0x2a2   : > { %v1001_v19 = vsel %vm892_vm7, %v993_v15, %v1000_v16  ;;  %v1003_v25 = vpack.c.bf16 %v997_v24, %v997_v24  ;;  %v619_v31 = vsel %vm618_vm9, -1e+09, %v3027_v30  ;;  %v878_v46 = vadd.f32 %v3308_v57, %v710_v45 }
 0x2a3   : > { %v1005_v21 = vpack.c.bf16 %v1001_v19, %v1001_v19  ;;  %v999_v27 = vsel %vm892_vm7, %v998_v26, %v981_v12  ;;  %v1255_v32 = vperm.slane %v619_v31, 0 }
 0x2a4   : > { %v1004_v28 = vpack.c.bf16 %v999_v27, %v999_v27  ;;  %v1142_v16 = vrot.slane %v878_v46, 4 }
 0x2a5   : > { %2287 = vmatmul.msk.bf16.vlgmr.msra.gmra.mxu3 %vm1257_vm8, %v1002_v20 }
 0x2a6   : > { %1290 = vmatpush.bf16.xpose.msrb.mxu3 %v1281_v0  ;;  %2290 = vmatmul.msk.bf16.vlgmr.msrb.gmra.mxu0 %vm1257_vm8, %v1005_v21 }
 0x2ae   : > { %1309 = vmatpush.bf16.xpose.msra.mxu3 %v1300_v22 }
 0x2b5   : > { %2288 = vmatmul.msk.bf16.vlgmr.msrb.gmra.mxu3 %vm1257_vm8, %v1003_v25 }
 0x2c5   : > { %2289 = vmatmul.msk.bf16.vlgmr.msra.gmra.mxu3 %vm1257_vm8, %v1004_v28 }
 0x323   : > { %v1330_v33 = vpop.f32.mrf.mxu0 }
 0x324   : > { %v1331_v34 = vadd.f32 %v1330_v33, %v1255_v32 }
 0x326   : > { %v1344_v35 = vsel %vm1334_vm10, %v1331_v34, -inf }
 0x327   : > { %1345 = vmax.xlane.f32.xlu2 %v1344_v35 }
 0x328   : > { %v1273_v36 = vpop.f32.mrf.mxu3 }
 0x329   : > { %v1274_v37 = vadd.f32 %v1273_v36, %v1255_v32 }
 0x32b   : > { %v1332_v38 = vpop.f32.mrf.mxu0  ;;  %v1335_v39 = vsel %vm1334_vm10, %v1274_v37, -inf }
 0x32f   : > { %1336 = vmax.xlane.f32.xlu2 %v1335_v39 }
 0x330   : > { %v1275_v40 = vpop.f32.mrf.mxu3 }
 0x338   : > { %v1292_v41 = vpop.f32.mrf.mxu3 }
 0x339   : > { %v1293_v42 = vadd.f32 %v1292_v41, %v1255_v32 }
 0x33b   : > { %v1338_v43 = vsel %vm1334_vm10, %v1293_v42, -inf }
 0x33c   : > { %1339 = vmax.xlane.f32.xlu0 %v1338_v43 }
 0x340   : > { %v1294_v44 = vpop.f32.mrf.mxu3 }
 0x347   : > { %1131 = vrot.lane.b32.xlu2 %v878_v46, %s3023_s14 }
 0x348   : > { %v1311_v47 = vpop.f32.mrf.mxu3 }
 0x349   : > { %v1312_v48 = vadd.f32 %v1311_v47, %v1255_v32 }
 0x34b   : > { %v1341_v49 = vsel %vm1334_vm10, %v1312_v48, -inf }
 0x34c   : > { %1342 = vmax.xlane.f32.xlu1 %v1341_v49 }
 0x350   : > { %v1313_v50 = vpop.f32.mrf.mxu3  ;;  %1137 = vrot.lane.b32.xlu0 %v878_v46, %s3022_s24 }
 0x365   : > { %1134 = vrot.lane.b32.xlu1 %v878_v46, %s3024_s12 }
 0x39a   : > { %v1346_v52 = vpop.xlane.xlu2 %1345 }
 0x39b   : > { %v1350_v54 = vsub.f32 %v1331_v34, %v1346_v52 }
 0x39d   : > { %v1357_v51 = vmul.f32 1.442695, %v1350_v54 }
 0x3a2   : > { %v1337_v53 = vpop.xlane.xlu2 %1336 }
 0x3a3   : > { %v1347_v10 = vsub.f32 %v1274_v37, %v1337_v53 }
 0x3a5   : > { %v1351_v55 = vmul.f32 1.442695, %v1347_v10 }
 0x3a7   : > { %2660 = vpow2.f32 %v1351_v55 }
 0x3a8   : > { %2662 = vpow2.f32 %v1357_v51 }
 0x3aa   : > { %v1132_v8 = vpop.permute.xlu2 %1131 }
 0x3ab   : > { %v1154_v11 = vrot.slane %v1132_v8, 4 }
 0x3ad   : > { %v3416_v57 = vpop.eup %2660 }
 0x3ae   : > { %v1359_v56 = vsel %vm1334_vm10, %v3416_v57, 0.0  ;;  %v3420_v61 = vpop.eup %2662 }
 0x3af   : > { %1360 = vadd.xlane.f32.xlu2 %v1359_v56  ;;  %v1340_v58 = vpop.xlane.xlu0 %1339  ;;  %v1368_v62 = vsel %vm1334_vm10, %v3420_v61, 0.0 }
 0x3b0   : > { %v1348_v59 = vsub.f32 %v1293_v42, %v1340_v58 }
 0x3b2   : > { %v1353_v60 = vmul.f32 1.442695, %v1348_v59 }
 0x3b4   : > { %2664 = vpow2.f32 %v1353_v60 }
 0x3b7   : > { %1369 = vadd.xlane.f32.xlu2 %v1368_v62 }
 0x3ba   : > { %v3424_v63 = vpop.eup %2664 }
 0x3bb   : > { %v1362_v0 = vsel %vm1334_vm10, %v3424_v63, 0.0 }
 0x3bc   : > { %1363 = vadd.xlane.f32.xlu0 %v1362_v0 }
 0x3bf   : > { %v1343_v1 = vpop.xlane.xlu1 %1342 }
 0x3c0   : > { %v1349_v2 = vsub.f32 %v1312_v48, %v1343_v1 }
 0x3c2   : > { %v1355_v3 = vmul.f32 1.442695, %v1349_v2  ;;  %v1138_v9 = vpop.permute.xlu0 %1137 }
 0x3c3   : > { %v1152_v12 = vrot.slane %v1138_v9, 4  ;;  %v1155_v13 = vsel %vm892_vm7, %v1138_v9, %v1154_v11 }
 0x3c4   : > { %2666 = vpow2.f32 %v1355_v3  ;;  %v1163_v15 = vperm.slane %v1155_v13, %v3314_v4 }
 0x3c5   : > { %v1153_v14 = vsel %vm892_vm7, %v1152_v12, %v1132_v8 }
 0x3c6   : > { %v1159_v18 = vperm.slane %v1153_v14, %v3314_v4  ;;  %v1176_v22 = vrot.slane %v1163_v15, 4 }
 0x3c8   : > { %v1164_v25 = vrot.slane %v1159_v18, 4 }
 0x3ca   : > { %v3428_v5 = vpop.eup %2666 }
 0x3cb   : > { %v1365_v6 = vsel %vm1334_vm10, %v3428_v5, 0.0 }
 0x3cc   : > { %1366 = vadd.xlane.f32.xlu1 %v1365_v6 }
 0x3d7   : > { %v1135_v19 = vpop.permute.xlu1 %1134 }
 0x3d8   : > { %v1140_v20 = vrot.slane %v1135_v19, 4  ;;  %v1143_v21 = vsel %vm892_vm7, %v1135_v19, %v1142_v16 }
 0x3d9   : > { %v1151_v23 = vperm.slane %v1143_v21, %v3314_v4 }
 0x3da   : > { %v1141_v24 = vsel %vm892_vm7, %v1140_v20, %v878_v46 }
 0x3db   : > { %v1147_v26 = vperm.slane %v1141_v24, %v3314_v4  ;;  %v1177_v27 = vsel %vm892_vm7, %v1176_v22, %v1151_v23  ;;  %v1178_v28 = vrot.slane %v1151_v23, 4 }
 0x3dc   : > { %v1183_v29 = vperm.slane %v1177_v27, %v3319_v17 }
 0x3dd   : > { %v1165_v30 = vsel %vm892_vm7, %v1164_v25, %v1147_v26  ;;  %v1166_v31 = vrot.slane %v1147_v26, 4  ;;  %v1179_v32 = vsel %vm892_vm7, %v1163_v15, %v1178_v28 }
 0x3de   : > { %v1171_v33 = vperm.slane %v1165_v30, %v3319_v17  ;;  %v1187_v34 = vperm.slane %v1179_v32, %v3319_v17  ;;  %v1192_v37 = vrot.slane %v1183_v29, 4 }
 0x3df   : > { %v1167_v35 = vsel %vm892_vm7, %v1159_v18, %v1166_v31 }
 0x3e0   : > { %v1175_v36 = vperm.slane %v1167_v35, %v3319_v17  ;;  %v1194_v38 = vrot.slane %v1187_v34, 4  ;;  %v1188_v39 = vrot.slane %v1171_v33, 4  ;;  %v1193_v46 = vsel %vm892_vm7, 0.0, %v1192_v37 }
 0x3e2   : > { %v1190_v40 = vrot.slane %v1175_v36, 4  ;;  %v1195_v41 = vsel %vm892_vm7, 0.0, %v1194_v38  ;;  %v1207_v42 = vsel %vm892_vm7, %v1194_v38, %v1183_v29  ;;  %v1189_v53 = vsel %vm892_vm7, 0.0, %v1188_v39 }
 0x3e3   : > { %v1211_v43 = vperm.slane %v1207_v42, %v3314_v4  ;;  %v1212_v44 = vrot.slane %v1195_v41, 4 }
 0x3e4   : > { %v1191_v45 = vsel %vm892_vm7, 0.0, %v1190_v40  ;;  %v1196_v47 = vsel %vm892_vm7, %v1190_v40, %v1171_v33 }
 0x3e5   : > { %v1201_v48 = vrot.slane %v1191_v45, 4  ;;  %v1213_v49 = vsel %vm892_vm7, %v1212_v44, %v1193_v46  ;;  %v1232_v50 = vrot.slane %v1211_v43, 4  ;;  %v1200_v52 = vperm.slane %v1196_v47, %v3314_v4 }
 0x3e6   : > { %v1217_v10 = vperm.slane %v1213_v49, %v3314_v4 }
 0x3e7   : > { %v1202_v54 = vsel %vm892_vm7, %v1201_v48, %v1189_v53  ;;  %v1220_v55 = vrot.slane %v1200_v52, 4 }
 0x3e8   : > { %v1206_v51 = vperm.slane %v1202_v54, %v3314_v4  ;;  %v1233_v56 = vsel %vm892_vm7, %v1217_v10, %v1232_v50  ;;  %v1230_v58 = vrot.slane %v1217_v10, 4 }
 0x3e9   : > { %v1241_v59 = vperm.slane %v1233_v56, %v3319_v17 }
 0x3ea   : > { %v1221_v60 = vsel %vm892_vm7, %v1206_v51, %v1220_v55  ;;  %v1218_v62 = vrot.slane %v1206_v51, 4  ;;  %v1231_v0 = vsel %vm892_vm7, %v1230_v58, %v1211_v43 }
 0x3eb   : > { %v1229_v1 = vperm.slane %v1221_v60, %v3319_v17  ;;  %v1246_v2 = vrot.slane %v1241_v59, 4  ;;  %v1237_v3 = vperm.slane %v1231_v0, %v3319_v17 }
 0x3ec   : > { %v1219_v6 = vsel %vm892_vm7, %v1218_v62, %v1200_v52 }
 0x3ed   : > { %v1247_v8 = vsel %vm892_vm7, %v1246_v2, %v1229_v1  ;;  %v1225_v9 = vperm.slane %v1219_v6, %v3319_v17  ;;  %v1242_v11 = vrot.slane %v1237_v3, 4  ;;  %v1248_v12 = vrot.slane %v1229_v1, 4 }
 0x3ee   : > { %v1252_v13 = vpack.c.bf16 %v1247_v8, %v1247_v8 }
 0x3ef   : > { %v1243_v14 = vsel %vm892_vm7, %v1242_v11, %v1225_v9  ;;  %v1244_v15 = vrot.slane %v1225_v9, 4  ;;  %v1249_v16 = vsel %vm892_vm7, %v1241_v59, %v1248_v12 }
 0x3f0   : > { %v1426_v18 = vsel %vm1386_vm11, %v1252_v13, 0  ;;  %v1250_v19 = vpack.c.bf16 %v1243_v14, %v1243_v14  ;;  %v1253_v20 = vpack.c.bf16 %v1249_v16, %v1249_v16 }
 0x3f1   : > { %1435 = vmatpush.bf16.msrb.mxu3 %v1426_v18  ;;  %v1245_v21 = vsel %vm892_vm7, %v1237_v3, %v1244_v15 }
 0x3f2   : > { %v1388_v22 = vsel %vm1386_vm11, %v1250_v19, 0  ;;  %v1445_v23 = vsel %vm1386_vm11, %v1253_v20, 0  ;;  %v1251_v24 = vpack.c.bf16 %v1245_v21, %v1245_v21 }
 0x3f3   : > { %1397 = vmatpush.bf16.msrb.mxu2 %v1388_v22  ;;  %1454 = vmatpush.bf16.msra.mxu0 %v1445_v23 }
 0x3f4   : > { %v1407_v25 = vsel %vm1386_vm11, %v1251_v24, 0 }
 0x3f7   : > { %1416 = vmatpush.bf16.msra.mxu2 %v1407_v25 }
 0x422   : > { %v1361_v26 = vpop.xlane.xlu2 %1360 }
 0x423   : > { %2668 = vrcp.f32 %v1361_v26 }
 0x429   : > { %v2669_v27 = vpop.eup %2668 }
 0x42a   : > { %v1375_v28 = vmul.f32 %v2669_v27, %v3416_v57  ;;  %v1370_v29 = vpop.xlane.xlu2 %1369 }
 0x42b   : > { %2670 = vrcp.f32 %v1370_v29 }
 0x42c   : > { %v1379_v30 = vpack.c.bf16 %v1375_v28, %v1375_v28 }
 0x42e   : > { %2291 = vmatmul.msk.bf16.vlgmr.msrb.gmra.mxu2 %vm1334_vm10, %v1379_v30 }
 0x42f   : > { %v1364_v31 = vpop.xlane.xlu0 %1363 }
 0x430   : > { %2672 = vrcp.f32 %v1364_v31 }
 0x431   : > { %v2671_v32 = vpop.eup %2670 }
 0x432   : > { %v1378_v33 = vmul.f32 %v2671_v32, %v3420_v61 }
 0x434   : > { %v1382_v34 = vpack.c.bf16 %v1378_v33, %v1378_v33 }
 0x436   : > { %v2673_v35 = vpop.eup %2672  ;;  %2294 = vmatmul.msk.bf16.vlgmr.msra.gmra.mxu0 %vm1334_vm10, %v1382_v34 }
 0x437   : > { %v1376_v36 = vmul.f32 %v2673_v35, %v3424_v63 }
 0x439   : > { %v1380_v37 = vpack.c.bf16 %v1376_v36, %v1376_v36 }
 0x43e   : > { %2292 = vmatmul.msk.bf16.vlgmr.msra.gmra.mxu2 %vm1334_vm10, %v1380_v37 }
 0x43f   : > { %v1367_v57 = vpop.xlane.xlu1 %1366 }
 0x440   : > { %2674 = vrcp.f32 %v1367_v57 }
 0x446   : > { %v2675_v38 = vpop.eup %2674 }
 0x447   : > { %v1377_v39 = vmul.f32 %v2675_v38, %v3428_v5 }
 0x449   : > { %v1381_v40 = vpack.c.bf16 %v1377_v39, %v1377_v39 }
 0x44b   : > { %2293 = vmatmul.msk.bf16.vlgmr.msrb.gmra.mxu3 %vm1334_vm10, %v1381_v40 }
 0x4b1   : > { %v1399_v41 = vpop.f32.mrf.mxu2 }
 0x4b2   : > { %v1462_v50 = vrot.slane %v1399_v41, 4 }
 0x4b3   : > { %v1456_v42 = vpop.f32.mrf.mxu0 }
 0x4b4   : > { %v1472_v46 = vrot.slane %v1456_v42, 4 }
 0x4b9   : > { %v1401_v61 = vpop.f32.mrf.mxu2 }
 0x4bb   : > { %v1458_v43 = vpop.f32.mrf.mxu0 }
 0x4c1   : > { %v1418_v44 = vpop.f32.mrf.mxu2 }
 0x4c2   : > { %v1474_v45 = vrot.slane %v1418_v44, 4  ;;  %v1473_v48 = vsel %vm892_vm7, %v1472_v46, %v1418_v44 }
 0x4c3   : > { %v1479_v5 = vperm.slane %v1473_v48, %v3314_v4  ;;  %v2489_v48 = vld [vmem:[#allocation11 + $0x30] sm:$0xff] }
 0x4c4   : > { %v1475_v63 = vsel %vm892_vm7, %v1456_v42, %v1474_v45 }
 0x4c5   : > { %v1483_v49 = vperm.slane %v1475_v63, %v3314_v4  ;;  %v1484_v56 = vrot.slane %v1479_v5, 4 }
 0x4c7   : > { %v1496_v54 = vrot.slane %v1483_v49, 4 }
 0x4c9   : > { %v1420_v47 = vpop.f32.mrf.mxu2 }
 0x4ca   : > { %v2490_v47 = vld [vmem:[#allocation11 + $0x38] sm:$0xff] }
 0x4cb   : > { %1656 = vmatpush.bf16.msrb.mxu1 %v2490_v47 }
 0x4ce   : > { %v1437_v52 = vpop.f32.mrf.mxu3 }
 0x4cf   : > { %v1460_v53 = vrot.slane %v1437_v52, 4  ;;  %v1463_v10 = vsel %vm892_vm7, %v1437_v52, %v1462_v50  ;;  %1657 = vmatpush.bf16.msrb.mxu1 %v2489_v48  ;;  %v2486_v50 = vld [vmem:[#allocation11 + $0x18] sm:$0xff]  ;;  %v2484_v52 = vld [vmem:[#allocation11 + $0x8] sm:$0xff]  ;;  %v2337_v48 = vld [vmem:[#allocation13 + $0x10] sm:$0xf] }
 0x4d0   : > { %v1471_v55 = vperm.slane %v1463_v10, %v3314_v4 }
 0x4d1   : > { %v1461_v51 = vsel %vm892_vm7, %v1460_v53, %v1399_v41  ;;  %v2483_v53 = vld [vmem:[#allocation11] sm:$0xff] }
 0x4d2   : > { %v1467_v58 = vperm.slane %v1461_v51, %v3314_v4  ;;  %v1497_v59 = vsel %vm892_vm7, %v1496_v54, %v1471_v55  ;;  %v1498_v60 = vrot.slane %v1471_v55, 4 }
 0x4d3   : > { %v1503_v62 = vperm.slane %v1497_v59, %v3319_v17 }
 0x4d4   : > { %v1485_v0 = vsel %vm892_vm7, %v1484_v56, %v1467_v58  ;;  %v1486_v1 = vrot.slane %v1467_v58, 4  ;;  %v1499_v2 = vsel %vm892_vm7, %v1483_v49, %v1498_v60  ;;  %v2488_v49 = vld [vmem:[#allocation11 + $0x28] sm:$0xff] }
 0x4d5   : > { %v1491_v3 = vperm.slane %v1485_v0, %v3319_v17  ;;  %v1507_v6 = vperm.slane %v1499_v2, %v3319_v17  ;;  %v1512_v12 = vrot.slane %v1503_v62, 4  ;;  %1658 = vmatpush.bf16.msrb.mxu1 %v2488_v49  ;;  %v2650_v60 = vld [vmem:[%s3597_s7] ss:$0 sm:$0xff]  ;;  %v2494_v49 = vld [vmem:[#allocation13 + $0x14] sm:$0xf0] }
 0x4d6   : > { %v1487_v8 = vsel %vm892_vm7, %v1479_v5, %v1486_v1  ;;  %v1439_v9 = vpop.f32.mrf.mxu3  ;;  %v2485_v5 = vld [vmem:[#allocation11 + $0x10] sm:$0xff] }
 0x4d7   : > { %v1495_v11 = vperm.slane %v1487_v8, %v3319_v17  ;;  %v1514_v13 = vrot.slane %v1507_v6, 4  ;;  %v1508_v14 = vrot.slane %v1491_v3, 4  ;;  %v1513_v22 = vsel %vm892_vm7, 0.0, %v1512_v12  ;;  %v2680_v1 = vld [vmem:[%s3261_s18] sm:$0xff]  ;;  %s3634_s18 = sld [smem:[#allocation32_spill]] }
 0x4d8   : > { %v2385_v12 = vld [vmem:[#allocation13 + $0x70] sm:$0xf] }
 0x4d9   : > { %v1510_v15 = vrot.slane %v1495_v11, 4  ;;  %v1515_v16 = vsel %vm892_vm7, 0.0, %v1514_v13  ;;  %v1527_v18 = vsel %vm892_vm7, %v1514_v13, %v1503_v62  ;;  %v1509_v28 = vsel %vm892_vm7, 0.0, %v1508_v14  ;;  %v2506_v13 = vld [vmem:[#allocation13 + $0x74] sm:$0xf0] }
 0x4da   : > { %v1531_v19 = vperm.slane %v1527_v18, %v3314_v4  ;;  %v1532_v20 = vrot.slane %v1515_v16, 4  ;;  %v2505_v14 = vld [vmem:[#allocation13 + $0x74] sm:$0xf]  ;;  %v2387_v16 = vld [vmem:[#allocation13 + $0x78] sm:$0xf0] }
 0x4db   : > { %v1511_v21 = vsel %vm892_vm7, 0.0, %v1510_v15  ;;  %v1516_v23 = vsel %vm892_vm7, %v1510_v15, %v1491_v3  ;;  %v2386_v15 = vor.u32 %v2506_v13, %v2385_v12  ;;  %v2377_v18 = vld [vmem:[#allocation13 + $0x60] sm:$0xf] }
 0x4dc   : > { %v1533_v24 = vsel %vm892_vm7, %v1532_v20, %v1513_v22  ;;  %v1520_v25 = vperm.slane %v1516_v23, %v3314_v4  ;;  %v1521_v26 = vrot.slane %v1511_v21, 4  ;;  %v1552_v27 = vrot.slane %v1531_v19, 4  ;;  %v2503_v21 = vld [vmem:[#allocation13 + $0x64] sm:$0xf]  ;;  %v2379_v22 = vld [vmem:[#allocation13 + $0x68] sm:$0xf0] }
 0x4dd   : > { %v1537_v29 = vperm.slane %v1533_v24, %v3314_v4  ;;  %v2390_v20 = vor.u32 %v2505_v14, %v2387_v16  ;;  %1819 = vmatpush.bf16.msrb.mxu2 %v2386_v15  ;;  %v2369_v24 = vld [vmem:[#allocation13 + $0x50] sm:$0xf]  ;;  %v2512_v14 = vld [vmem:[#allocation14 + $0x28] sm:$0xff] }
 0x4de   : > { %v1522_v30 = vsel %vm892_vm7, %v1521_v26, %v1509_v28  ;;  %v1540_v31 = vrot.slane %v1520_v25, 4  ;;  %v2501_v26 = vld [vmem:[#allocation13 + $0x54] sm:$0xf]  ;;  %v2520_v15 = vld [vmem:[#allocation14 + $0x68] sm:$0xff] }
 0x4df   : > { %v1526_v32 = vperm.slane %v1522_v30, %v3314_v4  ;;  %v1553_v33 = vsel %vm892_vm7, %v1537_v29, %v1552_v27  ;;  %v1550_v34 = vrot.slane %v1537_v29, 4  ;;  %1832 = vmatpush.bf16.msra.mxu3 %v2390_v20  ;;  %v2371_v27 = vld [vmem:[#allocation13 + $0x58] sm:$0xf0]  ;;  %v2361_v30 = vld [vmem:[#allocation13 + $0x40] sm:$0xf] }
 0x4e0   : > { %v1561_v35 = vperm.slane %v1553_v33, %v3319_v17  ;;  %v2374_v29 = vor.u32 %v2501_v26, %v2371_v27  ;;  %v2363_v33 = vld [vmem:[#allocation13 + $0x48] sm:$0xf0]  ;;  %v2510_v20 = vld [vmem:[#allocation14 + $0x18] sm:$0xff]  ;;  %v2651_v27 = vld [vmem:[%s3598_s8] ss:$0 sm:$0xff] }
 0x4e1   : > { %v1541_v36 = vsel %vm892_vm7, %v1526_v32, %v1540_v31  ;;  %v1538_v37 = vrot.slane %v1526_v32, 4  ;;  %v1551_v57 = vsel %vm892_vm7, %v1550_v34, %v1531_v19  ;;  %v2504_v19 = vld [vmem:[#allocation13 + $0x64] sm:$0xf0]  ;;  %v2499_v32 = vld [vmem:[#allocation13 + $0x44] sm:$0xf] }
 0x4e2   : > { %v1549_v38 = vperm.slane %v1541_v36, %v3319_v17  ;;  %v1566_v39 = vrot.slane %v1561_v35, 4  ;;  %v1557_v40 = vperm.slane %v1551_v57, %v3319_v17  ;;  %v2378_v23 = vor.u32 %v2504_v19, %v2377_v18  ;;  %v2500_v31 = vld [vmem:[#allocation13 + $0x44] sm:$0xf0]  ;;  %v2353_v57 = vld [vmem:[#allocation13 + $0x30] sm:$0xf]  ;;  %v2511_v18 = vld [vmem:[#allocation14 + $0x20] sm:$0xff] }
 0x4e3   : > { %v1539_v41 = vsel %vm892_vm7, %v1538_v37, %v1520_v25  ;;  %v2502_v25 = vld [vmem:[#allocation13 + $0x54] sm:$0xf0]  ;;  %v2362_v36 = vor.u32 %v2500_v31, %v2361_v30  ;;  %v2366_v37 = vor.u32 %v2499_v32, %v2363_v33  ;;  %v2519_v19 = vld [vmem:[#allocation14 + $0x60] sm:$0xff] }
 0x4e4   : > { %v1567_v42 = vsel %vm892_vm7, %v1566_v39, %v1549_v38  ;;  %v1568_v4 = vrot.slane %v1549_v38, 4  ;;  %v1545_v61 = vperm.slane %v1539_v41, %v3319_v17  ;;  %v1562_v43 = vrot.slane %v1557_v40, 4  ;;  %v2487_v17 = vld [vmem:[#allocation11 + $0x20] sm:$0xff]  ;;  %1820 = vmatpush.bf16.msrb.mxu2 %v2378_v23  ;;  %v2498_v38 = vld [vmem:[#allocation13 + $0x34] sm:$0xf0] }
 0x4e5   : > { %1575 = vrot.lane.b32.xlu2 %v1567_v42, %s3024_s12  ;;  %1659 = vmatpush.bf16.msrb.mxu1 %v2487_v17  ;;  %v2370_v28 = vor.u32 %v2502_v25, %v2369_v24  ;;  %v2497_v39 = vld [vmem:[#allocation13 + $0x34] sm:$0xf]  ;;  %v2354_v41 = vor.u32 %v2498_v38, %v2353_v57  ;;  %v2508_v38 = vld [vmem:[#allocation14 + $0x8] sm:$0xff] }
 0x4e6   : > { %v1569_v44 = vsel %vm892_vm7, %v1561_v35, %v1568_v4  ;;  %v1564_v45 = vrot.slane %v1545_v61, 4  ;;  %v1563_v46 = vsel %vm892_vm7, %v1562_v43, %v1545_v61  ;;  %v2345_v4 = vld [vmem:[#allocation13 + $0x20] sm:$0xf]  ;;  %v2496_v61 = vld [vmem:[#allocation13 + $0x24] sm:$0xf0]  ;;  %v2509_v24 = vld [vmem:[#allocation14 + $0x10] sm:$0xff] }
 0x4e7   : > { %1579 = vrot.lane.b32.xlu0 %v1569_v44, %s3023_s14  ;;  %v2495_v43 = vld [vmem:[#allocation13 + $0x24] sm:$0xf]  ;;  %v2347_v44 = vld [vmem:[#allocation13 + $0x28] sm:$0xf0]  ;;  %v2493_v17 = vld [vmem:[#allocation13 + $0x14] sm:$0xf] }
 0x4e8   : > { %v1565_v63 = vsel %vm892_vm7, %v1557_v40, %v1564_v45  ;;  %1821 = vmatpush.bf16.msrb.mxu2 %v2370_v28  ;;  %v2355_v40 = vld [vmem:[#allocation13 + $0x38] sm:$0xf0]  ;;  %v2350_v47 = vor.u32 %v2495_v43, %v2347_v44  ;;  %v2517_v25 = vld [vmem:[#allocation14 + $0x50] sm:$0xff]  ;;  %s3636_s14 = sld [smem:[#allocation35_spill]] }
 0x4e9   : > { %1571 = vrot.lane.b32.xlu1 %v1565_v63, %s3022_s24  ;;  %1660 = vmatpush.bf16.msrb.mxu1 %v2486_v50  ;;  %v2358_v42 = vor.u32 %v2497_v39, %v2355_v40  ;;  %v2339_v50 = vld [vmem:[#allocation13 + $0x18] sm:$0xf0]  ;;  %v2516_v39 = vld [vmem:[#allocation14 + $0x48] sm:$0xff]  ;;  %v2507_v40 = vld [vmem:[#allocation14] sm:$0xff] }
 0x4ec   : > { %1822 = vmatpush.bf16.msrb.mxu2 %v2362_v36 }
 0x4ed   : > { %1661 = vmatpush.bf16.msrb.mxu1 %v2485_v5 }
 0x4ee   : > { %s2020_s12 = scalar_lea.hbm %s3636_s14, %s2456_s21  ;;  %s2941_s13 = scalar_lea.hbm %s3636_s14, 16 }
 0x4ef   : > { %s2024_s6 = sshll.u32 %s2020_s12, 4  ;;  %s2025_s6 = int_to_ptr.hbm [resolvable:$true] %s2024_s6 }
 0x4f0   : > { %1823 = vmatpush.bf16.msrb.mxu2 %v2354_v41  ;;  %v2515_v41 = vld [vmem:[#allocation14 + $0x40] sm:$0xff]  ;;  %s2935_s10 = sshra.s32 %s2025_s6, 4  ;;  %s2936_s10 = int_to_ptr.hbm [resolvable:$true] %s2935_s10 }
 0x4f1   : > { %1662 = vmatpush.bf16.msrb.mxu1 %v2484_v52  ;;  %v2338_v52 = vor.u32 %v2494_v49, %v2337_v48  ;;  %s2937_s19 = scalar_lea.hbm %s2936_s10, 8  ;;  %p2942_p7 = scmp.lt.s32.totalorder %s2936_s10, %s3636_s14 }
 0x4f2   : > { %p2938_p1 = scmp.ne.s32.totalorder %s2936_s10, %s2937_s19  ;;  %p2943_p9 = scmp.lt.s32.totalorder %s2941_s13, %s2937_s19 }
 0x4f4   : > { %p2939_p3 = pnand %p2938_p1, %p3202_p5  ;;  %p2944_p4 = por %p2943_p9, %p2942_p7 }
 0x4f5   : > { %1663 = vmatpush.bf16.msrb.mxu1 %v2483_v53 }
 0x4f6   : > { %p2940_p12 = pneg %p2939_p3 }
 0x4f8   : > { %p2945_p8 = pnand %p2944_p4, %p2940_p12 }
 0x53f   : > { %v1576_v54 = vpop.permute.xlu2 %1575 }
 0x559   : > { %v1580_v51 = vpop.permute.xlu0 %1579 }
 0x55b   : > { %v1572_v10 = vpop.permute.xlu1 %1571 }
 0x55c   : > { %v1582_v55 = vsel %vm1257_vm8, %v1563_v46, %v1572_v10  ;;  %v2346_v46 = vor.u32 %v2496_v61, %v2345_v4  ;;  %v2342_v10 = vor.u32 %v2493_v17, %v2339_v50  ;;  %v2653_v50 = vld [vmem:[%s3635_s11] ss:$0 sm:$0xff] }
 0x55d   : > { %v1584_v56 = vsel %vm1583_vm12, %v1582_v55, %v1576_v54  ;;  %v2329_v54 = vld [vmem:[#allocation13] sm:$0xf]  ;;  %v2492_v55 = vld [vmem:[#allocation13 + $0x4] sm:$0xf0] }
 0x55e   : > { %v1586_v58 = vsel %vm1585_vm13, %v1584_v56, %v1580_v51  ;;  %1824 = vmatpush.bf16.msrb.mxu2 %v2346_v46  ;;  %v2491_v51 = vld [vmem:[#allocation13 + $0x4] sm:$0xf]  ;;  %v2331_v56 = vld [vmem:[#allocation13 + $0x8] sm:$0xf0] }
 0x55f   : > { %v1587_v59 = vpack.c.bf16 %v1586_v58, %v1586_v58 }
 0x561   : > { %1664 = vmatmul.bf16.vlgmr.msrb.gmra.mxu1 %v1587_v59  ;;  %v2330_v59 = vor.u32 %v2492_v55, %v2329_v54 }
 0x562   : > { %1825 = vmatpush.bf16.msrb.mxu2 %v2338_v52 }
 0x566   : > { %1826 = vmatpush.bf16.msrb.mxu2 %v2330_v59 }
 0x5de   : > { %v1665_v62 = vpop.f32.mrf.mxu1 }
 0x5df   : > { %v1666_v0 = vadd.f32 %v2650_v60, %v1665_v62  ;;  %v2514_v60 = vld [vmem:[#allocation14 + $0x38] sm:$0xff] }
 0x5e0   : > { %v2522_v62 = vld [vmem:[#allocation14 + $0x78] sm:$0xff]  ;;  %1981 = vmatpush.bf16.msrb.mxu0 %v2514_v60 }
 0x5e1   : > { %v3532_v2 = vadd.f32 %v2680_v1, %v1666_v0  ;;  %v2334_v1 = vor.u32 %v2491_v51, %v2331_v56  ;;  %1994 = vmatpush.bf16.msra.mxu1 %v2522_v62 }
 0x5e3   : > { %1672 = vadd.xlane.f32.xlu1 %v3532_v2 }
 0x5e6   : > { %v1667_v3 = vpop.f32.mrf.mxu1 }
 0x5e7   : > { %v2513_v3 = vld [vmem:[#allocation14 + $0x30] sm:$0xff] }
 0x5e8   : > { %1982 = vmatpush.bf16.msrb.mxu0 %v2513_v3 }
 0x5ec   : > { %1983 = vmatpush.bf16.msrb.mxu0 %v2512_v14 }
 0x5f0   : > { %1984 = vmatpush.bf16.msrb.mxu0 %v2511_v18 }
 0x5f4   : > { %1985 = vmatpush.bf16.msrb.mxu0 %v2510_v20 }
 0x5f8   : > { %1986 = vmatpush.bf16.msrb.mxu0 %v2509_v24 }
 0x5fc   : > { %1987 = vmatpush.bf16.msrb.mxu0 %v2508_v38 }
 0x600   : > { %1988 = vmatpush.bf16.msrb.mxu0 %v2507_v40 }
 0x656   : > { %v1673_v6 = vpop.xlane.xlu1 %1672 }
 0x657   : > { %v1674_v8 = vmul.f32 %v1673_v6, %v3290_v7  ;;  %v2382_v7 = vor.u32 %v2503_v21, %v2379_v22  ;;  %v2521_v6 = vld [vmem:[#allocation14 + $0x70] sm:$0xff]  ;;  %v2518_v21 = vld [vmem:[#allocation14 + $0x58] sm:$0xff] }
 0x658   : > { %1995 = vmatpush.bf16.msra.mxu1 %v2521_v6 }
 0x659   : > { %v3537_v9 = vsub.f32 %v3532_v2, %v1674_v8  ;;  %1833 = vmatpush.bf16.msra.mxu3 %v2382_v7 }
 0x65b   : > { %v1676_v11 = vmul.f32 %v3537_v9, %v3537_v9  ;;  %v1710_v32 = vmul.f32 %v2651_v27, %v3537_v9  ;;  %v1733_v9 = vld [vmem:[%s3634_s18] sm:$0x3] }
 0x65c   : > { %1996 = vmatpush.bf16.msra.mxu1 %v2520_v15  ;;  %v1736_v4 = vperm.slane %v1733_v9, 1 }
 0x65d   : > { %1677 = vadd.xlane.f32.xlu0 %v1676_v11  ;;  %1834 = vmatpush.bf16.msra.mxu3 %v2374_v29 }
 0x660   : > { %1997 = vmatpush.bf16.msra.mxu1 %v2519_v19 }
 0x661   : > { %1835 = vmatpush.bf16.msra.mxu3 %v2366_v37 }
 0x664   : > { %1998 = vmatpush.bf16.msra.mxu1 %v2518_v21 }
 0x665   : > { %1836 = vmatpush.bf16.msra.mxu3 %v2358_v42  ;;  %v1735_v42 = vperm.slane %v1733_v9, 0 }
 0x668   : > { %1999 = vmatpush.bf16.msra.mxu1 %v2517_v25 }
 0x669   : > { %1837 = vmatpush.bf16.msra.mxu3 %v2350_v47 }
 0x66c   : > { %2000 = vmatpush.bf16.msra.mxu1 %v2516_v39 }
 0x66d   : > { %1838 = vmatpush.bf16.msra.mxu3 %v2342_v10 }
 0x670   : > { %2001 = vmatpush.bf16.msra.mxu1 %v2515_v41 }
 0x671   : > { %1839 = vmatpush.bf16.msra.mxu3 %v2334_v1 }
 0x6d0   : > { %v1678_v34 = vpop.xlane.xlu0 %1677 }
 0x6d1   : > { %v1679_v35 = vmul.f32 0.007874016, %v1678_v34  ;;  %v2652_v34 = vld [vmem:[%s3599_s9] ss:$0 sm:$0xff] }
 0x6d3   : > { %2676 = vrsqrt.f32 %v1679_v35  ;;  %vm1687_vm14 = vcmp.eq.f32.partialorder %v1679_v35, inf  ;;  %v1690_v11 = vand.u32 2147483648, %v1679_v35  ;;  %vm1689_vm15 = vcmp.eq.f32.partialorder %v1679_v35, 0.0 }
 0x6d9   : > { %v2677_v45 = vpop.eup %2676 }
 0x6da   : > { %v1681_v63 = vmul.f32 %v2677_v45, %v1679_v35 }
 0x6dc   : > { %v1682_v5 = vmul.f32 %v2677_v45, %v1681_v63 }
 0x6de   : > { %v1683_v53 = vmul.f32 0.5, %v1682_v5 }
 0x6e0   : > { %v1684_v58 = vsub.f32 1.5, %v1683_v53 }
 0x6e2   : > { %v1685_v0 = vmul.f32 %v2677_v45, %v1684_v58 }
 0x6e4   : > { %v1686_v8 = vmul.f32 %v1685_v0, %v1679_v35 }
 0x6e6   : > { %v1688_v12 = vsel %vm1687_vm14, %v1679_v35, %v1686_v8 }
 0x6e7   : > { %v1691_v13 = vsel %vm1689_vm15, %v1690_v11, %v1688_v12 }
 0x6e8   : > { %v1692_v16 = vadd.f32 1e-06, %v1691_v13 }
 0x6ea   : > { %2678 = vrcp.f32 %v1692_v16  ;;  %v1704_v26 = vand.u32 2147483648, %v1692_v16  ;;  %v1702_v29 = vand.u32 2147483647, %v1692_v16  ;;  %vm1698_vm1 = vweird.f32 %v1692_v16 }
 0x6ec   : > { %v1705_v31 = vor.u32 1.1754944e-38, %v1704_v26  ;;  %vm1703_vm3 = vcmp.eq.f32.partialorder %v1702_v29, 8.507059e+37 }
 0x6f0   : > { %v2679_v22 = vpop.eup %2678 }
 0x6f1   : > { %v1694_v23 = vmul.f32 %v2679_v22, %v1692_v16  ;;  %vm1699_vm0 = vweird.f32 %v2679_v22 }
 0x6f2   : > { %vm1700_vm2 = vmor %vm1698_vm1, %vm1699_vm0 }
 0x6f3   : > { %v1695_v7 = vsub.f32 1.0, %v1694_v23 }
 0x6f5   : > { %v1696_v28 = vmul.f32 %v2679_v22, %v1695_v7 }
 0x6f7   : > { %v1697_v30 = vadd.f32 %v2679_v22, %v1696_v28 }
 0x6f9   : > { %v1701_v33 = vsel %vm1700_vm2, %v2679_v22, %v1697_v30 }
 0x6fa   : > { %v1706_v35 = vsel %vm1703_vm3, %v1705_v31, %v1701_v33 }
 0x6fb   : > { %v1711_v36 = vmul.f32 %v1710_v32, %v1706_v35 }
 0x6fd   : > { %v1715_v37 = vadd.f32 %v2652_v34, %v1711_v36 }
 0x6ff   : > { %v1716_v57 = vpack.c.bf16 %v1715_v37, %v1715_v37 }
 0x701   : > { %1827 = vmatmul.bf16.vlgmr.msrb.gmra.mxu2 %v1716_v57  ;;  %1840 = vmatmul.bf16.vlgmr.msra.gmra.mxu3 %v1716_v57 }
 0x784   : > { %v1828_v61 = vpop.f32.mrf.mxu2  ;;  %v1841_v43 = vpop.f32.mrf.mxu3 }
 0x785   : > { %v1829_v44 = vadd.f32 %v1828_v61, %v1735_v42  ;;  %v1842_v45 = vadd.f32 %v1841_v43, %v1736_v4 }
 0x787   : > { %v1845_v46 = vmax.f32 %v1829_v44, 0.0  ;;  %v1846_v63 = vmax.f32 %v1842_v45, 0.0 }
 0x789   : > { %v1847_v47 = vpack.c.bf16 %v1845_v46, %v1845_v46  ;;  %v1848_v48 = vpack.c.bf16 %v1846_v63, %v1846_v63 }
 0x78b   : > { %1989 = vmatmul.bf16.vlgmr.msrb.gmra.mxu0 %v1847_v47  ;;  %2002 = vmatmul.bf16.vlgmr.msra.gmra.mxu1 %v1848_v48 }
 0x78c   : > { %v1830_v49 = vpop.f32.mrf.mxu2  ;;  %v1843_v17 = vpop.f32.mrf.mxu3 }
 0x808   : > { %v1990_v5 = vpop.f32.mrf.mxu0  ;;  %v2003_v52 = vpop.f32.mrf.mxu1 }
 0x809   : > { %v1991_v53 = vadd.f32 %v2653_v50, %v1990_v5 }
 0x80b   : > { %v2004_v10 = vadd.f32 %v2003_v52, %v1991_v53 }
 0x80d   : > { %v2007_v54 = vadd.f32 %v2004_v10, %v3532_v2 }
 0x80f   : > { %2008 = vst [vmem:[%s614_s3] sm:$0xff] %v2007_v54 }
 0x810   : > { %v1992_v55 = vpop.f32.mrf.mxu0  ;;  %v2005_v51 = vpop.f32.mrf.mxu1 }
 0x811   : > { %2948 = shalt.err (!%p2945_p8)
}
 0x812   : > { %2551 = dma.vmem_to_hbm [thread:$0]  (%p3202_p5), %s2023_s25, 128, %s2025_s6, %s2010_s20  }
 0x813 PF: > { %s2036_s4 = sand.u32 1, %s2995_s29   ;;  %p3637_p10 = scmp.ge.s32.totalorder %s3007_s16, 2 }
 0x814   : > { %s2037_s21 = scalar_lea.sflag [#allocation4], %s2036_s4 }
 0x815   : > { %p2580_p13 = pnand %p3637_p10, %p3206_p6 }
 0x817   : > { %p2581_p11 = pneg %p2580_p13 }
 0x819   : > { %2990 = dma.done.wait (%p2581_p11), %s2037_s21, 128  }
 0x81a   : > { %2992 = vsyncadd (%p2581_p11), %s2037_s21, 4294967168  ;;  %s3638_s16 = sld [smem:[#allocation25_spill]]  ;;  %s3641_s29 = smov %s2999_s30 }
 0x81b   : > { %s3639_s23 = sld [smem:[#allocation24_spill]] }
 0x81c   : > { %s3640_s15 = sld [smem:[#allocation26_spill]] }
 0x820   : > { %p33_p0 = scmp.ge.s32.totalorder %s3638_s16, 4  }
 0x821   : > { %s3642_s30 = smov %s3639_s23 }
 0x822   :  { %35 = sbr.rel (!%p33_p0) target bundleno = 20 (0x14), region = 158 }
 0x827   :  { %2043 = vsyncpa [#allocation3], 1 }
 0x828   :  { %2045 = vsyncpa [#allocation3 + $0x1], 1 }
 0x829   :  { %2046 = vsyncpa [#allocation6], 1 }
 0x82a   :  { %2048 = vsyncpa [#allocation6 + $0x1], 1 }
 0x82b   :  { %2049 = vsyncpa [#allocation9], 1 }
 0x82c   :  { %2050 = vsyncpa [#allocation12], 1 }
 0x82d   :  { %2051 = vsyncpa [#allocation15], 1 }
 0x82e   :  { %2052 = vsyncpa [#allocation4], 1 }
 0x82f   :  { %2054 = vsyncpa [#allocation4 + $0x1], 1 }

</bundles_post_ra>
